<compile_context>
chip_gen: v5e
topology: v5e:2x2
jax: 0.10.0
libtpu: 0.0.40
codegen_flags: <defaults>
</compile_context>

<pallas_src>
import math
from functools import partial

import jax
import jax.numpy as jnp
from jax.experimental import pallas as pl
from jax.experimental.pallas import tpu as pltpu


def _round_up(x, m):
    return ((x + m - 1) // m) * m


def _ffn_kernel(x_ref, w1_ref, b1_ref, gamma_ref, beta_ref, w2_ref, b2_ref,
                out_ref,
                sum_ref, sumsq_ref, scale_ref, shift_ref,
                *, n_valid, tile_n, n_tiles, eps):
    p = pl.program_id(0)   # phase: 0 = BatchNorm statistics, 1 = output pass
    i = pl.program_id(1)   # batch tile

    # Shared by both phases: h = relu(x @ W1^T + b1). bf16 MXU operands
    # (cast in-register, no wrapper copy of X), f32 accumulation.
    x_bf = x_ref[...].astype(jnp.bfloat16)
    h = jnp.dot(x_bf, w1_ref[...], preferred_element_type=jnp.float32)
    h = jnp.maximum(h + b1_ref[...], 0.0)

    rem = n_valid % tile_n  # static remainder of the last batch tile

    # ---------------- phase 0: accumulate global BN statistics ----------------
    @pl.when(p == 0)
    def _stats_phase():
        @pl.when(i == 0)
        def _():
            sum_ref[...] = jnp.zeros_like(sum_ref)
            sumsq_ref[...] = jnp.zeros_like(sumsq_ref)

        def accum(hv):
            sum_ref[...] += jnp.sum(hv, axis=0, keepdims=True)
            sumsq_ref[...] += jnp.sum(hv * hv, axis=0, keepdims=True)

        if rem == 0:
            accum(h)
        else:
            # Only the last tile can contain out-of-bounds rows; keep the
            # iota/compare/select off the hot path of every other tile.
            @pl.when(i < n_tiles - 1)
            def _():
                accum(h)

            @pl.when(i == n_tiles - 1)
            def _():
                row = jax.lax.broadcasted_iota(jnp.int32, h.shape, 0)
                accum(jnp.where(row < rem, h, 0.0))

    # -------- phase boundary: fold statistics into BN scale / shift ----------
    @pl.when((p == 1) & (i == 0))
    def _fold():
        inv_n = 1.0 / n_valid
        mean = sum_ref[...] * inv_n
        var = jnp.maximum(sumsq_ref[...] * inv_n - mean * mean, 0.0)
        scale = gamma_ref[...] * jax.lax.rsqrt(var + eps)
        scale_ref[...] = scale
        shift_ref[...] = beta_ref[...] - mean * scale

    # ---------------- phase 1: BN + output layer ------------------------------
    @pl.when(p == 1)
    def _output_phase():
        h_bn = h * scale_ref[...] + shift_ref[...]          # f32, lane-aligned bcast
        out_ref[...] = (
            jnp.dot(h_bn.astype(jnp.bfloat16), w2_ref[...],
                    preferred_element_type=jnp.float32)
            + b2_ref[...]
        )


def feed_forward_net(x, w1, b1, gamma, beta, w2, b2, *, tile_n=512, eps=1e-5):
    """x: (N, F); w1: (H, F); b1: (H,); gamma/beta: (H,); w2: (O, H); b2: (O,).

    PyTorch forward semantics of FeedForwardNet defaults (num_hidden=1, relu,
    training-mode BatchNorm1d with global batch statistics).
    """
    n, f = x.shape
    h_dim = w1.shape[0]
    o_dim = w2.shape[0]
    f32, bf16 = jnp.float32, jnp.bfloat16

    # Large batch tiles (feedback: 512-1024), 16-aligned for bf16 sublane packing.
    tile_n = max(16, min(_round_up(tile_n, 16), _round_up(n, 16)))
    n_tiles = -(-n // tile_n)
    n_grid = n_tiles * tile_n

    # X is fed unpadded / uncast. Only in the tiny-batch corner case
    # (single block larger than the batch) do we pad the (small) batch so every
    # block stays in bounds; for large N there is no wrapper copy of X at all
    # and the partial last tile is masked inside the kernel.
    x_in = x if tile_n <= n else jnp.pad(x, ((0, n_grid - n), (0, 0)))

    # Tiny weight/bias reshapes & casts only (F x H, H x O — negligible).
    w1_t = w1.T.astype(bf16)                       # (F, H)  bf16 MXU operand
    w2_t = w2.T.astype(bf16)                       # (H, O)  bf16 MXU operand
    b1_r = b1.astype(f32).reshape(1, h_dim)
    gamma_r = gamma.astype(f32).reshape(1, h_dim)
    beta_r = beta.astype(f32).reshape(1, h_dim)
    b2_r = b2.astype(f32).reshape(1, o_dim)

    kernel = partial(_ffn_kernel, n_valid=n, tile_n=tile_n, n_tiles=n_tiles,
                     eps=eps)

    # Advisory cost hint (X streamed twice; first matmul runs in both phases).
    flops = 4 * n * f * h_dim + 2 * n * h_dim * o_dim
    bytes_accessed = (2 * n * f * 4 + n * o_dim * 4
                      + 2 * (f * h_dim + h_dim * o_dim) + 4 * 4 * h_dim)

    out = pl.pallas_call(
        kernel,
        out_shape=jax.ShapeDtypeStruct((n_grid, o_dim), f32),
        grid=(2, n_tiles),                          # (phase, batch tile)
        in_specs=[
            pl.BlockSpec((tile_n, f), lambda p, i: (i, 0)),      # X tile (per phase)
            pl.BlockSpec((f, h_dim), lambda p, i: (0, 0)),       # W1^T, resident
            pl.BlockSpec((1, h_dim), lambda p, i: (0, 0)),       # b1
            pl.BlockSpec((1, h_dim), lambda p, i: (0, 0)),       # gamma
            pl.BlockSpec((1, h_dim), lambda p, i: (0, 0)),       # beta
            pl.BlockSpec((h_dim, o_dim), lambda p, i: (0, 0)),   # W2^T, resident
            pl.BlockSpec((1, o_dim), lambda p, i: (0, 0)),       # b2
        ],
        # During phase 0 the output map pins block 0 (no garbage writebacks);
        # phase 1 walks the batch tiles and each block is written exactly once.
        out_specs=pl.BlockSpec((tile_n, o_dim), lambda p, i: (p * i, 0)),
        scratch_shapes=[
            pltpu.VMEM((1, h_dim), f32),   # running sum(h)
            pltpu.VMEM((1, h_dim), f32),   # running sum(h*h)
            pltpu.VMEM((1, h_dim), f32),   # BN scale
            pltpu.VMEM((1, h_dim), f32),   # BN shift
        ],
        compiler_params=pltpu.CompilerParams(
            dimension_semantics=("arbitrary", "arbitrary")),
        cost_estimate=pl.CostEstimate(
            flops=flops, transcendentals=h_dim, bytes_accessed=bytes_accessed),
    )(x_in, w1_t, b1_r, gamma_r, beta_r, w2_t, b2_r)

    return out if n_grid == n else out[:n]


def xavier_uniform(key, out_dim, in_dim):
    bound = math.sqrt(6.0 / (in_dim + out_dim))
    return jax.random.uniform(
        key, (out_dim, in_dim), jnp.float32, minval=-bound, maxval=bound)


def linear_bias(key, out_dim, in_dim):
    # PyTorch nn.Linear default bias init: U(-1/sqrt(fan_in), 1/sqrt(fan_in))
    bound = 1.0 / math.sqrt(in_dim)
    return jax.random.uniform(key, (out_dim,), jnp.float32,
                              minval=-bound, maxval=bound)


if __name__ == "__main__":
    batch = 1000             # not a tile multiple -> exercises the masked tail
    input_dim = 32
    hidden_dim = input_dim   # module default: hidden_dim = input_dim
    output_dim = 4

    key = jax.random.PRNGKey(0)
    kx, kw1, kb1, kw2, kb2 = jax.random.split(key, 5)

    x = jax.random.normal(kx, (batch, input_dim), jnp.float32)

    # Deterministic parameter init (xavier weights, PyTorch-default biases).
    w1 = xavier_uniform(kw1, hidden_dim, input_dim)       # hidden Linear (out, in)
    b1 = linear_bias(kb1, hidden_dim, input_dim)
    gamma = jnp.ones((hidden_dim,), jnp.float32)          # BatchNorm1d affine init
    beta = jnp.zeros((hidden_dim,), jnp.float32)
    w2 = xavier_uniform(kw2, output_dim, hidden_dim)      # output Linear (out, in)
    b2 = linear_bias(kb2, output_dim, hidden_dim)

    out = feed_forward_net(x, w1, b1, gamma, beta, w2, b2)   # default tile_n=512
    jax.block_until_ready(out)
    assert out.shape == (batch, output_dim)

    # Pure-JAX f32 reference (PyTorch training-mode BatchNorm1d semantics).
    h_ref = jnp.maximum(x @ w1.T + b1, 0.0)
    mean = h_ref.mean(axis=0, keepdims=True)
    var = ((h_ref - mean) ** 2).mean(axis=0, keepdims=True)
    h_ref = (h_ref - mean) * jax.lax.rsqrt(var + 1e-5) * gamma + beta
    ref = h_ref @ w2.T + b2

    # bf16 MXU operands (f32 accumulation) -> slightly looser tolerance.
    max_err = float(jnp.max(jnp.abs(out - ref)))
    assert jnp.allclose(out, ref, atol=5e-2, rtol=5e-2), max_err

    print("KERNEL_OK")
</pallas_src>

<mosaic_0001>
module attributes {stable_mosaic.version = 11 : i64} {
  func.func @_ffn_kernel(%arg0: i32, %arg1: i32, %arg2: memref<512x32xf32, #tpu.memory_space<vmem>>, %arg3: memref<32x32xbf16, #tpu.memory_space<vmem>>, %arg4: memref<1x32xf32, #tpu.memory_space<vmem>>, %arg5: memref<1x32xf32, #tpu.memory_space<vmem>>, %arg6: memref<1x32xf32, #tpu.memory_space<vmem>>, %arg7: memref<32x4xbf16, #tpu.memory_space<vmem>>, %arg8: memref<1x4xf32, #tpu.memory_space<vmem>>, %arg9: memref<512x4xf32, #tpu.memory_space<vmem>>, %arg10: memref<1x32xf32, #tpu.memory_space<vmem>>, %arg11: memref<1x32xf32, #tpu.memory_space<vmem>>, %arg12: memref<1x32xf32, #tpu.memory_space<vmem>>, %arg13: memref<1x32xf32, #tpu.memory_space<vmem>>) attributes {dimension_semantics = [#tpu.dimension_semantics<arbitrary>, #tpu.dimension_semantics<arbitrary>], iteration_bounds = array<i64: 2, 2>, scalar_prefetch = 0 : i64, scratch_operands = 4 : i64, tpu.core_type = #tpu.core_type<tc>, window_params = [{transform_indices = @transform_0, window_bounds = array<i64: 512, 32>}, {pipeline_mode = #tpu.pipeline_mode<synchronous>, transform_indices = @transform_1, window_bounds = array<i64: 32, 32>}, {pipeline_mode = #tpu.pipeline_mode<synchronous>, transform_indices = @transform_2, window_bounds = array<i64: 1, 32>}, {pipeline_mode = #tpu.pipeline_mode<synchronous>, transform_indices = @transform_3, window_bounds = array<i64: 1, 32>}, {pipeline_mode = #tpu.pipeline_mode<synchronous>, transform_indices = @transform_4, window_bounds = array<i64: 1, 32>}, {pipeline_mode = #tpu.pipeline_mode<synchronous>, transform_indices = @transform_5, window_bounds = array<i64: 32, 4>}, {pipeline_mode = #tpu.pipeline_mode<synchronous>, transform_indices = @transform_6, window_bounds = array<i64: 1, 4>}, {transform_indices = @transform_7, window_bounds = array<i64: 512, 4>}]} {
    %c0 = arith.constant 0 : index
    %c0_0 = arith.constant 0 : index
    %0 = vector.load %arg2[%c0, %c0_0] : memref<512x32xf32, #tpu.memory_space<vmem>>, vector<512x32xf32>
    %1 = arith.truncf %0 : vector<512x32xf32> to vector<512x32xbf16>
    %c0_1 = arith.constant 0 : index
    %c0_2 = arith.constant 0 : index
    %2 = vector.load %arg3[%c0_1, %c0_2] : memref<32x32xbf16, #tpu.memory_space<vmem>>, vector<32x32xbf16>
    %cst = arith.constant dense<0.000000e+00> : vector<512x32xf32>
    %3 = tpu.matmul %1, %2, %cst {dimension_numbers = #tpu.dot_dimension_numbers<[1], [0], [0], [1], [0, 0, 1, 1], [], []>} : vector<512x32xbf16>, vector<32x32xbf16>, vector<512x32xf32> -> vector<512x32xf32>
    %c0_3 = arith.constant 0 : index
    %c0_4 = arith.constant 0 : index
    %4 = vector.load %arg4[%c0_3, %c0_4] : memref<1x32xf32, #tpu.memory_space<vmem>>, vector<1x32xf32>
    %5 = vector.broadcast %4 : vector<1x32xf32> to vector<512x32xf32>
    %6 = arith.addf %3, %5 : vector<512x32xf32>
    %cst_5 = arith.constant 0.000000e+00 : f32
    %7 = vector.broadcast %cst_5 : f32 to vector<512x32xf32>
    %8 = arith.maximumf %6, %7 : vector<512x32xf32>
    %c0_i32 = arith.constant 0 : i32
    %9 = arith.cmpi eq, %arg0, %c0_i32 : i32
    %10 = arith.extui %9 : i1 to i32
    %c0_i32_6 = arith.constant 0 : i32
    %11 = arith.cmpi ne, %10, %c0_i32_6 : i32
    scf.if %11 {
      %c0_i32_11 = arith.constant 0 : i32
      %20 = arith.cmpi eq, %arg1, %c0_i32_11 : i32
      %21 = arith.extui %20 : i1 to i32
      %c0_i32_12 = arith.constant 0 : i32
      %22 = arith.cmpi ne, %21, %c0_i32_12 : i32
      scf.if %22 {
        %cst_17 = arith.constant 0.000000e+00 : f32
        %29 = vector.broadcast %cst_17 : f32 to vector<1x32xf32>
        %c0_18 = arith.constant 0 : index
        %c0_19 = arith.constant 0 : index
        %30 = vector.load %arg10[%c0_18, %c0_19] : memref<1x32xf32, #tpu.memory_space<vmem>>, vector<1x32xf32>
        tpu.vector_store %arg10[%c0_18, %c0_19], %29 {strides = array<i32>} : memref<1x32xf32, #tpu.memory_space<vmem>>, vector<1x32xf32>,
        %cst_20 = arith.constant 0.000000e+00 : f32
        %31 = vector.broadcast %cst_20 : f32 to vector<1x32xf32>
        %c0_21 = arith.constant 0 : index
        %c0_22 = arith.constant 0 : index
        %32 = vector.load %arg11[%c0_21, %c0_22] : memref<1x32xf32, #tpu.memory_space<vmem>>, vector<1x32xf32>
        tpu.vector_store %arg11[%c0_21, %c0_22], %31 {strides = array<i32>} : memref<1x32xf32, #tpu.memory_space<vmem>>, vector<1x32xf32>,
      } else {
      }
      %c1_i32_13 = arith.constant 1 : i32
      %23 = arith.cmpi slt, %arg1, %c1_i32_13 : i32
      %24 = arith.extui %23 : i1 to i32
      %c0_i32_14 = arith.constant 0 : i32
      %25 = arith.cmpi ne, %24, %c0_i32_14 : i32
      scf.if %25 {
        %c0_17 = arith.constant 0 : index
        %c0_18 = arith.constant 0 : index
        %29 = vector.load %arg10[%c0_17, %c0_18] : memref<1x32xf32, #tpu.memory_space<vmem>>, vector<1x32xf32>
        %cst_19 = arith.constant dense<0.000000e+00> : vector<32xf32>
        %30 = vector.multi_reduction <add>, %8, %cst_19 [0] : vector<512x32xf32> to vector<32xf32>
        %31 = vector.shape_cast %30 : vector<32xf32> to vector<1x32xf32>
        %32 = arith.addf %29, %31 : vector<1x32xf32>
        %c0_20 = arith.constant 0 : index
        %c0_21 = arith.constant 0 : index
        %33 = vector.load %arg10[%c0_20, %c0_21] : memref<1x32xf32, #tpu.memory_space<vmem>>, vector<1x32xf32>
        tpu.vector_store %arg10[%c0_20, %c0_21], %32 {strides = array<i32>} : memref<1x32xf32, #tpu.memory_space<vmem>>, vector<1x32xf32>,
        %c0_22 = arith.constant 0 : index
        %c0_23 = arith.constant 0 : index
        %34 = vector.load %arg11[%c0_22, %c0_23] : memref<1x32xf32, #tpu.memory_space<vmem>>, vector<1x32xf32>
        %35 = arith.mulf %8, %8 : vector<512x32xf32>
        %cst_24 = arith.constant dense<0.000000e+00> : vector<32xf32>
        %36 = vector.multi_reduction <add>, %35, %cst_24 [0] : vector<512x32xf32> to vector<32xf32>
        %37 = vector.shape_cast %36 : vector<32xf32> to vector<1x32xf32>
        %38 = arith.addf %34, %37 : vector<1x32xf32>
        %c0_25 = arith.constant 0 : index
        %c0_26 = arith.constant 0 : index
        %39 = vector.load %arg11[%c0_25, %c0_26] : memref<1x32xf32, #tpu.memory_space<vmem>>, vector<1x32xf32>
        tpu.vector_store %arg11[%c0_25, %c0_26], %38 {strides = array<i32>} : memref<1x32xf32, #tpu.memory_space<vmem>>, vector<1x32xf32>,
      } else {
      }
      %c1_i32_15 = arith.constant 1 : i32
      %26 = arith.cmpi eq, %arg1, %c1_i32_15 : i32
      %27 = arith.extui %26 : i1 to i32
      %c0_i32_16 = arith.constant 0 : i32
      %28 = arith.cmpi ne, %27, %c0_i32_16 : i32
      scf.if %28 {
        %29 = tpu.iota {dimensions = array<i32: 0>} : vector<512x32xi32>
        %c488_i32 = arith.constant 488 : i32
        %30 = vector.broadcast %c488_i32 : i32 to vector<512x32xi32>
        %31 = arith.cmpi slt, %29, %30 : vector<512x32xi32>
        %cst_17 = arith.constant 0.000000e+00 : f32
        %32 = vector.broadcast %cst_17 : f32 to vector<512x32xf32>
        %33 = arith.select %31, %8, %32 : vector<512x32xi1>, vector<512x32xf32>
        %c0_18 = arith.constant 0 : index
        %c0_19 = arith.constant 0 : index
        %34 = vector.load %arg10[%c0_18, %c0_19] : memref<1x32xf32, #tpu.memory_space<vmem>>, vector<1x32xf32>
        %cst_20 = arith.constant dense<0.000000e+00> : vector<32xf32>
        %35 = vector.multi_reduction <add>, %33, %cst_20 [0] : vector<512x32xf32> to vector<32xf32>
        %36 = vector.shape_cast %35 : vector<32xf32> to vector<1x32xf32>
        %37 = arith.addf %34, %36 : vector<1x32xf32>
        %c0_21 = arith.constant 0 : index
        %c0_22 = arith.constant 0 : index
        %38 = vector.load %arg10[%c0_21, %c0_22] : memref<1x32xf32, #tpu.memory_space<vmem>>, vector<1x32xf32>
        tpu.vector_store %arg10[%c0_21, %c0_22], %37 {strides = array<i32>} : memref<1x32xf32, #tpu.memory_space<vmem>>, vector<1x32xf32>,
        %c0_23 = arith.constant 0 : index
        %c0_24 = arith.constant 0 : index
        %39 = vector.load %arg11[%c0_23, %c0_24] : memref<1x32xf32, #tpu.memory_space<vmem>>, vector<1x32xf32>
        %40 = arith.mulf %33, %33 : vector<512x32xf32>
        %cst_25 = arith.constant dense<0.000000e+00> : vector<32xf32>
        %41 = vector.multi_reduction <add>, %40, %cst_25 [0] : vector<512x32xf32> to vector<32xf32>
        %42 = vector.shape_cast %41 : vector<32xf32> to vector<1x32xf32>
        %43 = arith.addf %39, %42 : vector<1x32xf32>
        %c0_26 = arith.constant 0 : index
        %c0_27 = arith.constant 0 : index
        %44 = vector.load %arg11[%c0_26, %c0_27] : memref<1x32xf32, #tpu.memory_space<vmem>>, vector<1x32xf32>
        tpu.vector_store %arg11[%c0_26, %c0_27], %43 {strides = array<i32>} : memref<1x32xf32, #tpu.memory_space<vmem>>, vector<1x32xf32>,
      } else {
      }
    } else {
    }
    %c1_i32 = arith.constant 1 : i32
    %12 = arith.cmpi eq, %arg0, %c1_i32 : i32
    %c0_i32_7 = arith.constant 0 : i32
    %13 = arith.cmpi eq, %arg1, %c0_i32_7 : i32
    %14 = arith.andi %12, %13 : i1
    %15 = arith.extui %14 : i1 to i32
    %c0_i32_8 = arith.constant 0 : i32
    %16 = arith.cmpi ne, %15, %c0_i32_8 : i32
    scf.if %16 {
      %c0_11 = arith.constant 0 : index
      %c0_12 = arith.constant 0 : index
      %20 = vector.load %arg10[%c0_11, %c0_12] : memref<1x32xf32, #tpu.memory_space<vmem>>, vector<1x32xf32>
      %cst_13 = arith.constant 1.000000e-03 : f32
      %21 = vector.broadcast %cst_13 : f32 to vector<1x32xf32>
      %22 = arith.mulf %20, %21 : vector<1x32xf32>
      %c0_14 = arith.constant 0 : index
      %c0_15 = arith.constant 0 : index
      %23 = vector.load %arg11[%c0_14, %c0_15] : memref<1x32xf32, #tpu.memory_space<vmem>>, vector<1x32xf32>
      %cst_16 = arith.constant 1.000000e-03 : f32
      %24 = vector.broadcast %cst_16 : f32 to vector<1x32xf32>
      %25 = arith.mulf %23, %24 : vector<1x32xf32>
      %26 = arith.mulf %22, %22 : vector<1x32xf32>
      %27 = arith.subf %25, %26 : vector<1x32xf32>
      %cst_17 = arith.constant 0.000000e+00 : f32
      %28 = vector.broadcast %cst_17 : f32 to vector<1x32xf32>
      %29 = arith.maximumf %27, %28 : vector<1x32xf32>
      %c0_18 = arith.constant 0 : index
      %c0_19 = arith.constant 0 : index
      %30 = vector.load %arg5[%c0_18, %c0_19] : memref<1x32xf32, #tpu.memory_space<vmem>>, vector<1x32xf32>
      %cst_20 = arith.constant 9.99999974E-6 : f32
      %31 = vector.broadcast %cst_20 : f32 to vector<1x32xf32>
      %32 = arith.addf %29, %31 : vector<1x32xf32>
      %33 = math.rsqrt %32 : vector<1x32xf32>
      %34 = arith.mulf %30, %33 : vector<1x32xf32>
      %c0_21 = arith.constant 0 : index
      %c0_22 = arith.constant 0 : index
      %35 = vector.load %arg12[%c0_21, %c0_22] : memref<1x32xf32, #tpu.memory_space<vmem>>, vector<1x32xf32>
      tpu.vector_store %arg12[%c0_21, %c0_22], %34 {strides = array<i32>} : memref<1x32xf32, #tpu.memory_space<vmem>>, vector<1x32xf32>,
      %c0_23 = arith.constant 0 : index
      %c0_24 = arith.constant 0 : index
      %36 = vector.load %arg6[%c0_23, %c0_24] : memref<1x32xf32, #tpu.memory_space<vmem>>, vector<1x32xf32>
      %37 = arith.mulf %22, %34 : vector<1x32xf32>
      %38 = arith.subf %36, %37 : vector<1x32xf32>
      %c0_25 = arith.constant 0 : index
      %c0_26 = arith.constant 0 : index
      %39 = vector.load %arg13[%c0_25, %c0_26] : memref<1x32xf32, #tpu.memory_space<vmem>>, vector<1x32xf32>
      tpu.vector_store %arg13[%c0_25, %c0_26], %38 {strides = array<i32>} : memref<1x32xf32, #tpu.memory_space<vmem>>, vector<1x32xf32>,
    } else {
    }
    %c1_i32_9 = arith.constant 1 : i32
    %17 = arith.cmpi eq, %arg0, %c1_i32_9 : i32
    %18 = arith.extui %17 : i1 to i32
    %c0_i32_10 = arith.constant 0 : i32
    %19 = arith.cmpi ne, %18, %c0_i32_10 : i32
    scf.if %19 {
      %c0_11 = arith.constant 0 : index
      %c0_12 = arith.constant 0 : index
      %20 = vector.load %arg12[%c0_11, %c0_12] : memref<1x32xf32, #tpu.memory_space<vmem>>, vector<1x32xf32>
      %21 = vector.broadcast %20 : vector<1x32xf32> to vector<512x32xf32>
      %22 = arith.mulf %8, %21 : vector<512x32xf32>
      %c0_13 = arith.constant 0 : index
      %c0_14 = arith.constant 0 : index
      %23 = vector.load %arg13[%c0_13, %c0_14] : memref<1x32xf32, #tpu.memory_space<vmem>>, vector<1x32xf32>
      %24 = vector.broadcast %23 : vector<1x32xf32> to vector<512x32xf32>
      %25 = arith.addf %22, %24 : vector<512x32xf32>
      %26 = arith.truncf %25 : vector<512x32xf32> to vector<512x32xbf16>
      %c0_15 = arith.constant 0 : index
      %c0_16 = arith.constant 0 : index
      %27 = vector.load %arg7[%c0_15, %c0_16] : memref<32x4xbf16, #tpu.memory_space<vmem>>, vector<32x4xbf16>
      %cst_17 = arith.constant dense<0.000000e+00> : vector<512x4xf32>
      %28 = tpu.matmul %26, %27, %cst_17 {dimension_numbers = #tpu.dot_dimension_numbers<[1], [0], [0], [1], [0, 0, 1, 1], [], []>} : vector<512x32xbf16>, vector<32x4xbf16>, vector<512x4xf32> -> vector<512x4xf32>
      %c0_18 = arith.constant 0 : index
      %c0_19 = arith.constant 0 : index
      %29 = vector.load %arg8[%c0_18, %c0_19] : memref<1x4xf32, #tpu.memory_space<vmem>>, vector<1x4xf32>
      %30 = vector.broadcast %29 : vector<1x4xf32> to vector<512x4xf32>
      %31 = arith.addf %28, %30 : vector<512x4xf32>
      %c0_20 = arith.constant 0 : index
      %c0_21 = arith.constant 0 : index
      %32 = vector.load %arg9[%c0_20, %c0_21] : memref<512x4xf32, #tpu.memory_space<vmem>>, vector<512x4xf32>
      tpu.vector_store %arg9[%c0_20, %c0_21], %31 {strides = array<i32>} : memref<512x4xf32, #tpu.memory_space<vmem>>, vector<512x4xf32>,
    } else {
    }
    return
  }
  func.func @transform_0(%arg0: i32, %arg1: i32) -> (i32, i32) {
    %c0_i32 = arith.constant 0 : i32
    %c0_i32_0 = arith.constant 0 : i32
    return %arg1, %c0_i32 : i32, i32
  }
  func.func @transform_1(%arg0: i32, %arg1: i32) -> (i32, i32) {
    %c0_i32 = arith.constant 0 : i32
    %c0_i32_0 = arith.constant 0 : i32
    %c0_i32_1 = arith.constant 0 : i32
    return %c0_i32, %c0_i32_0 : i32, i32
  }
  func.func @transform_2(%arg0: i32, %arg1: i32) -> (i32, i32) {
    %c0_i32 = arith.constant 0 : i32
    %c0_i32_0 = arith.constant 0 : i32
    %c0_i32_1 = arith.constant 0 : i32
    return %c0_i32, %c0_i32_0 : i32, i32
  }
  func.func @transform_3(%arg0: i32, %arg1: i32) -> (i32, i32) {
    %c0_i32 = arith.constant 0 : i32
    %c0_i32_0 = arith.constant 0 : i32
    %c0_i32_1 = arith.constant 0 : i32
    return %c0_i32, %c0_i32_0 : i32, i32
  }
  func.func @transform_4(%arg0: i32, %arg1: i32) -> (i32, i32) {
    %c0_i32 = arith.constant 0 : i32
    %c0_i32_0 = arith.constant 0 : i32
    %c0_i32_1 = arith.constant 0 : i32
    return %c0_i32, %c0_i32_0 : i32, i32
  }
  func.func @transform_5(%arg0: i32, %arg1: i32) -> (i32, i32) {
    %c0_i32 = arith.constant 0 : i32
    %c0_i32_0 = arith.constant 0 : i32
    %c0_i32_1 = arith.constant 0 : i32
    return %c0_i32, %c0_i32_0 : i32, i32
  }
  func.func @transform_6(%arg0: i32, %arg1: i32) -> (i32, i32) {
    %c0_i32 = arith.constant 0 : i32
    %c0_i32_0 = arith.constant 0 : i32
    %c0_i32_1 = arith.constant 0 : i32
    return %c0_i32, %c0_i32_0 : i32, i32
  }
  func.func @transform_7(%arg0: i32, %arg1: i32) -> (i32, i32) {
    %0 = arith.muli %arg0, %arg1 : i32
    %c0_i32 = arith.constant 0 : i32
    %c0_i32_0 = arith.constant 0 : i32
    return %0, %c0_i32 : i32, i32
  }
}

</mosaic_0001>

<bundles_post_ra>
// kernel: tpu_custom_call.1
= control target key start
LH: loop header
LB: loop body
LE: loop exit
PB: predicated region body
PF: predicated region fallthrough
CT: control target
= control target key end

     0   :  { %s2516_s24 = smov 0   ;;  %s2518_s25 = smov 0   ;;  %s3946_s0 = inlined_call_operand.vmem [shape: f32[1000,32], index: 0, kind: input, shape index: {}]   ;;  %s3947_s1 = inlined_call_operand.vmem [shape: bf16[32,32], index: 1, kind: input, shape index: {}]   ;;  %s3948_s2 = inlined_call_operand.vmem [shape: f32[1,32], index: 2, kind: input, shape index: {}]   ;;  %s3949_s3 = inlined_call_operand.vmem [shape: f32[1,32], index: 3, kind: input, shape index: {}]   ;;  %s3950_s4 = inlined_call_operand.vmem [shape: f32[1,32], index: 4, kind: input, shape index: {}]   ;;  %s3951_s5 = inlined_call_operand.vmem [shape: bf16[32,4], index: 5, kind: input, shape index: {}]   ;;  %s3952_s6 = inlined_call_operand.vmem [shape: f32[1,4], index: 6, kind: input, shape index: {}]   ;;  %s3953_s7 = inlined_call_operand.vmem [shape: f32[1024,4], index: 7, kind: output, shape index: {}]  }
   0x1   :  { %s2520_s26 = smov 0   ;;  %s2522_s27 = smov 0  }
   0x2   :  { %s2524_s28 = smov 0  }
   0x3 LB: > { %s26_s29 = sadd.s32 1, %s2465_s26  ;;  %s29_s30 = sadd.s32 1, %s2469_s27  ;;  %s2473_s28 = sphi %s2524_s28, %s17_s28   ;;  %s2469_s27 = sphi %s2522_s27, %s4089_s27   ;;  %s2465_s26 = sphi %s2520_s26, %s4088_s26   ;;  %s2461_s25 = sphi %s2518_s25, %s4087_s25   ;;  %s2457_s24 = sphi %s2516_s24, %s4086_s24  }
   0x4   : > { %p27_p0 = scmp.ge.s32.totalorder %s26_s29, 2  ;;  %p2280_p1 = scmp.ge.s32.totalorder %s2473_s28, 1 }
   0x5   : > { %p260_p2 = scmp.lt.s32.totalorder %s2473_s28, 5 }
   0x6   : > { %s4091_s29 = smov (%p27_p0, %s26_s29), 0  ;;  %s4093_s30 = smov (!%p27_p0, %s29_s30), %s2469_s27 }
   0x7   : > { %p261_p3 = pnand %p2280_p1, %p260_p2  ;;  %p31_p4 = scmp.ge.s32.totalorder %s4093_s30, 2 }
   0x9   : > { %s4095_s30 = smov (%p31_p4, %s4093_s30), 0  ;;  %264 = sbr.rel (%p261_p3) target bundleno = 919 (0x397), region = 48 }
   0xe   : > { %s311_s8 = smul.u32 %s2457_s24, %s2461_s25  ;;  %v2373_v0 = vld [vmem:[%s3947_s1 + $0x8] sm:$0xff]  ;;  %s2281_s11 = sshll.u32 %s2457_s24, 6  ;;  %v2372_v1 = vld [vmem:[%s3947_s1] sm:$0xff]  ;;  %vm436_vm0 = vcmask 261120  }
   0xf   : > { %p302_p5 = scmp.lt.s32.totalorder %s2281_s11, 124  ;;  %539 = vmatpush.bf16.msra.mxu0 %v2373_v0  ;;  %2376 = vmatpush.bf16.msra.mxu1 %v2373_v0  ;;  %p2325_p7 = scmp.ne.s32.totalorder %s2461_s25, 0 }
  0x10   : > { %s2283_s12 = sshll.u32 %s311_s8, 6  ;;  %2377 = vmatpush.bf16.msra.mxu2 %v2373_v0  ;;  %2378 = vmatpush.bf16.msra.mxu3 %v2373_v0  ;;  %p2326_p8 = scmp.ne.s32.totalorder (!%p2325_p7), %s2457_s24, 0 }
  0x11   : > { %p313_p6 = scmp.lt.s32.totalorder %s2283_s12, 127  ;;  %s4097_s11 = smov (!%p302_p5, %s2281_s11), 124 }
  0x12   : > { %s2282_s15 = sshll.u32 %s4097_s11, 3 }
  0x13   : > { %s4099_s12 = smov (!%p313_p6, %s2283_s12), 127  ;;  %540 = vmatpush.bf16.msra.mxu0 %v2372_v1  ;;  %2379 = vmatpush.bf16.msra.mxu1 %v2372_v1  ;;  %s2562_s19 = scalar_lea.vmem %s3946_s0, %s2282_s15 }
  0x14   : > { %s2284_s16 = sshll.u32 %s4099_s12, 3  ;;  %2380 = vmatpush.bf16.msra.mxu2 %v2372_v1  ;;  %2381 = vmatpush.bf16.msra.mxu3 %v2372_v1  ;;  %v320_v2 = vld [vmem:[%s2562_s19] sm:$0xff]  ;;  %v321_v3 = vld [vmem:[%s2562_s19 + $0x8] sm:$0xff]  ;;  %v322_v14 = vld [vmem:[%s2562_s19 + $0x10] sm:$0xff] }
  0x15   : > { %s2567_s22 = scalar_lea.vmem %s3953_s7, %s2284_s16  ;;  %v336_v4 = vld [vmem:[%s2562_s19 + $0x80] sm:$0xff]  ;;  %v384_v5 = vpack.c.bf16 %v321_v3, %v320_v2  ;;  %v337_v6 = vld [vmem:[%s2562_s19 + $0x88] sm:$0xff]  ;;  %v323_v15 = vld [vmem:[%s2562_s19 + $0x18] sm:$0xff] }
  0x16   : > { %v352_v7 = vld [vmem:[%s2562_s19 + $0x100] sm:$0xff]  ;;  %v353_v8 = vld [vmem:[%s2562_s19 + $0x108] sm:$0xff]  ;;  %v392_v9 = vpack.c.bf16 %v337_v6, %v336_v4  ;;  %v338_v16 = vld [vmem:[%s2562_s19 + $0x90] sm:$0xff]  ;;  %v385_v22 = vpack.c.bf16 %v323_v15, %v322_v14 }
  0x17   : > { %v400_v10 = vpack.c.bf16 %v353_v8, %v352_v7  ;;  %v368_v11 = vld [vmem:[%s2562_s19 + $0x180] sm:$0xff]  ;;  %v369_v12 = vld [vmem:[%s2562_s19 + $0x188] sm:$0xff]  ;;  %2293 = vmatmul.msk.bf16.vlgmr.msra.gmra.mxu0 %vm436_vm0, %v384_v5  ;;  %v339_v17 = vld [vmem:[%s2562_s19 + $0x98] sm:$0xff] }
  0x18   : > { %v408_v13 = vpack.c.bf16 %v369_v12, %v368_v11  ;;  %2301 = vmatmul.msk.bf16.vlgmr.msra.gmra.mxu1 %vm436_vm0, %v392_v9  ;;  %v354_v18 = vld [vmem:[%s2562_s19 + $0x110] sm:$0xff]  ;;  %v355_v19 = vld [vmem:[%s2562_s19 + $0x118] sm:$0xff]  ;;  %v393_v23 = vpack.c.bf16 %v339_v17, %v338_v16  ;;  %v324_v26 = vld [vmem:[%s2562_s19 + $0x20] sm:$0xff] }
  0x19   : > { %2309 = vmatmul.msk.bf16.vlgmr.msra.gmra.mxu2 %vm436_vm0, %v400_v10  ;;  %v370_v20 = vld [vmem:[%s2562_s19 + $0x190] sm:$0xff]  ;;  %v371_v21 = vld [vmem:[%s2562_s19 + $0x198] sm:$0xff]  ;;  %v401_v24 = vpack.c.bf16 %v355_v19, %v354_v18  ;;  %v325_v27 = vld [vmem:[%s2562_s19 + $0x28] sm:$0xff] }
  0x1a   : > { %2317 = vmatmul.msk.bf16.vlgmr.msra.gmra.mxu3 %vm436_vm0, %v408_v13  ;;  %v409_v25 = vpack.c.bf16 %v371_v21, %v370_v20  ;;  %v340_v28 = vld [vmem:[%s2562_s19 + $0xa0] sm:$0xff]  ;;  %v341_v29 = vld [vmem:[%s2562_s19 + $0xa8] sm:$0xff]  ;;  %v386_v34 = vpack.c.bf16 %v325_v27, %v324_v26  ;;  %v326_v38 = vld [vmem:[%s2562_s19 + $0x30] sm:$0xff] }
  0x1b   : > { %v356_v30 = vld [vmem:[%s2562_s19 + $0x120] sm:$0xff]  ;;  %v357_v31 = vld [vmem:[%s2562_s19 + $0x128] sm:$0xff]  ;;  %v394_v35 = vpack.c.bf16 %v341_v29, %v340_v28  ;;  %v327_v39 = vld [vmem:[%s2562_s19 + $0x38] sm:$0xff] }
  0x1c   : > { %v372_v32 = vld [vmem:[%s2562_s19 + $0x1a0] sm:$0xff]  ;;  %v373_v33 = vld [vmem:[%s2562_s19 + $0x1a8] sm:$0xff]  ;;  %v402_v36 = vpack.c.bf16 %v357_v31, %v356_v30  ;;  %v342_v40 = vld [vmem:[%s2562_s19 + $0xb0] sm:$0xff]  ;;  %v387_v46 = vpack.c.bf16 %v327_v39, %v326_v38 }
  0x1d   : > { %v410_v37 = vpack.c.bf16 %v373_v33, %v372_v32  ;;  %v343_v41 = vld [vmem:[%s2562_s19 + $0xb8] sm:$0xff]  ;;  %v358_v42 = vld [vmem:[%s2562_s19 + $0x130] sm:$0xff]  ;;  %v328_v50 = vld [vmem:[%s2562_s19 + $0x40] sm:$0xff] }
  0x1e   : > { %v359_v43 = vld [vmem:[%s2562_s19 + $0x138] sm:$0xff]  ;;  %v374_v44 = vld [vmem:[%s2562_s19 + $0x1b0] sm:$0xff]  ;;  %v395_v47 = vpack.c.bf16 %v343_v41, %v342_v40  ;;  %v329_v51 = vld [vmem:[%s2562_s19 + $0x48] sm:$0xff] }
  0x1f   : > { %v375_v45 = vld [vmem:[%s2562_s19 + $0x1b8] sm:$0xff]  ;;  %v403_v48 = vpack.c.bf16 %v359_v43, %v358_v42  ;;  %v344_v52 = vld [vmem:[%s2562_s19 + $0xc0] sm:$0xff]  ;;  %v345_v53 = vld [vmem:[%s2562_s19 + $0xc8] sm:$0xff]  ;;  %v388_v58 = vpack.c.bf16 %v329_v51, %v328_v50 }
  0x20   : > { %v411_v49 = vpack.c.bf16 %v375_v45, %v374_v44  ;;  %v360_v54 = vld [vmem:[%s2562_s19 + $0x140] sm:$0xff]  ;;  %v361_v55 = vld [vmem:[%s2562_s19 + $0x148] sm:$0xff]  ;;  %v396_v59 = vpack.c.bf16 %v345_v53, %v344_v52  ;;  %v330_v62 = vld [vmem:[%s2562_s19 + $0x50] sm:$0xff] }
  0x21   : > { %v376_v56 = vld [vmem:[%s2562_s19 + $0x1c0] sm:$0xff]  ;;  %v377_v57 = vld [vmem:[%s2562_s19 + $0x1c8] sm:$0xff]  ;;  %v404_v60 = vpack.c.bf16 %v361_v55, %v360_v54  ;;  %v331_v63 = vld [vmem:[%s2562_s19 + $0x58] sm:$0xff] }
  0x22   : > { %v412_v61 = vpack.c.bf16 %v377_v57, %v376_v56  ;;  %v346_v0 = vld [vmem:[%s2562_s19 + $0xd0] sm:$0xff]  ;;  %v347_v1 = vld [vmem:[%s2562_s19 + $0xd8] sm:$0xff]  ;;  %v389_v6 = vpack.c.bf16 %v331_v63, %v330_v62  ;;  %v332_v10 = vld [vmem:[%s2562_s19 + $0x60] sm:$0xff] }
  0x23   : > { %v362_v2 = vld [vmem:[%s2562_s19 + $0x150] sm:$0xff]  ;;  %v363_v3 = vld [vmem:[%s2562_s19 + $0x158] sm:$0xff]  ;;  %v397_v7 = vpack.c.bf16 %v347_v1, %v346_v0  ;;  %v333_v11 = vld [vmem:[%s2562_s19 + $0x68] sm:$0xff] }
  0x24   : > { %v378_v4 = vld [vmem:[%s2562_s19 + $0x1d0] sm:$0xff]  ;;  %v379_v5 = vld [vmem:[%s2562_s19 + $0x1d8] sm:$0xff]  ;;  %v405_v8 = vpack.c.bf16 %v363_v3, %v362_v2  ;;  %v348_v12 = vld [vmem:[%s2562_s19 + $0xe0] sm:$0xff]  ;;  %v390_v18 = vpack.c.bf16 %v333_v11, %v332_v10 }
  0x25   : > { %v413_v9 = vpack.c.bf16 %v379_v5, %v378_v4  ;;  %v349_v13 = vld [vmem:[%s2562_s19 + $0xe8] sm:$0xff]  ;;  %v364_v14 = vld [vmem:[%s2562_s19 + $0x160] sm:$0xff]  ;;  %v366_v26 = vld [vmem:[%s2562_s19 + $0x170] sm:$0xff] }
  0x26   : > { %v365_v15 = vld [vmem:[%s2562_s19 + $0x168] sm:$0xff]  ;;  %v380_v16 = vld [vmem:[%s2562_s19 + $0x1e0] sm:$0xff]  ;;  %v398_v19 = vpack.c.bf16 %v349_v13, %v348_v12  ;;  %v367_v27 = vld [vmem:[%s2562_s19 + $0x178] sm:$0xff] }
  0x27   : > { %2294 = vmatmul.msk.bf16.gmra.mxu0 %vm436_vm0, %v385_v22  ;;  %v381_v17 = vld [vmem:[%s2562_s19 + $0x1e8] sm:$0xff]  ;;  %v406_v20 = vpack.c.bf16 %v365_v15, %v364_v14  ;;  %v334_v22 = vld [vmem:[%s2562_s19 + $0x70] sm:$0xff]  ;;  %v383_v29 = vld [vmem:[%s2562_s19 + $0x1f8] sm:$0xff]  ;;  %v407_v32 = vpack.c.bf16 %v367_v27, %v366_v26 }
  0x28   : > { %2302 = vmatmul.msk.bf16.gmra.mxu1 %vm436_vm0, %v393_v23  ;;  %v414_v21 = vpack.c.bf16 %v381_v17, %v380_v16  ;;  %v335_v23 = vld [vmem:[%s2562_s19 + $0x78] sm:$0xff]  ;;  %v382_v28 = vld [vmem:[%s2562_s19 + $0x1f0] sm:$0xff] }
  0x29   : > { %2310 = vmatmul.msk.bf16.gmra.mxu2 %vm436_vm0, %v401_v24  ;;  %v350_v24 = vld [vmem:[%s2562_s19 + $0xf0] sm:$0xff]  ;;  %v391_v30 = vpack.c.bf16 %v335_v23, %v334_v22  ;;  %v415_v33 = vpack.c.bf16 %v383_v29, %v382_v28 }
  0x2a   : > { %2318 = vmatmul.msk.bf16.gmra.mxu3 %vm436_vm0, %v409_v25  ;;  %v351_v25 = vld [vmem:[%s2562_s19 + $0xf8] sm:$0xff] }
  0x2b   : > { %v399_v31 = vpack.c.bf16 %v351_v25, %v350_v24 }
  0x37   : > { %2295 = vmatmul.msk.bf16.gmra.mxu0 %vm436_vm0, %v386_v34  ;;  %v2668_v34 = vld [vmem:[%s3948_s2] ss:$0 sm:$0xff] }
  0x38   : > { %2303 = vmatmul.msk.bf16.gmra.mxu1 %vm436_vm0, %v394_v35 }
  0x39   : > { %2311 = vmatmul.msk.bf16.gmra.mxu2 %vm436_vm0, %v402_v36 }
  0x3a   : > { %2319 = vmatmul.msk.bf16.gmra.mxu3 %vm436_vm0, %v410_v37 }
  0x47   : > { %2296 = vmatmul.msk.bf16.gmra.mxu0 %vm436_vm0, %v387_v46 }
  0x48   : > { %2304 = vmatmul.msk.bf16.gmra.mxu1 %vm436_vm0, %v395_v47 }
  0x49   : > { %2312 = vmatmul.msk.bf16.gmra.mxu2 %vm436_vm0, %v403_v48 }
  0x4a   : > { %2320 = vmatmul.msk.bf16.gmra.mxu3 %vm436_vm0, %v411_v49 }
  0x57   : > { %2297 = vmatmul.msk.bf16.gmra.mxu0 %vm436_vm0, %v388_v58 }
  0x58   : > { %2305 = vmatmul.msk.bf16.gmra.mxu1 %vm436_vm0, %v396_v59 }
  0x59   : > { %2313 = vmatmul.msk.bf16.gmra.mxu2 %vm436_vm0, %v404_v60 }
  0x5a   : > { %2321 = vmatmul.msk.bf16.gmra.mxu3 %vm436_vm0, %v412_v61 }
  0x67   : > { %2298 = vmatmul.msk.bf16.gmra.mxu0 %vm436_vm0, %v389_v6 }
  0x68   : > { %2306 = vmatmul.msk.bf16.gmra.mxu1 %vm436_vm0, %v397_v7 }
  0x69   : > { %2314 = vmatmul.msk.bf16.gmra.mxu2 %vm436_vm0, %v405_v8 }
  0x6a   : > { %2322 = vmatmul.msk.bf16.gmra.mxu3 %vm436_vm0, %v413_v9 }
  0x77   : > { %2299 = vmatmul.msk.bf16.gmra.mxu0 %vm436_vm0, %v390_v18 }
  0x78   : > { %2307 = vmatmul.msk.bf16.gmra.mxu1 %vm436_vm0, %v398_v19 }
  0x79   : > { %2315 = vmatmul.msk.bf16.gmra.mxu2 %vm436_vm0, %v406_v20 }
  0x7a   : > { %2323 = vmatmul.msk.bf16.gmra.mxu3 %vm436_vm0, %v414_v21 }
  0x87   : > { %2300 = vmatmul.msk.bf16.gmra.mxu0 %vm436_vm0, %v391_v30 }
  0x88   : > { %2308 = vmatmul.msk.bf16.gmra.mxu1 %vm436_vm0, %v399_v31 }
  0x89   : > { %2316 = vmatmul.msk.bf16.gmra.mxu2 %vm436_vm0, %v407_v32 }
  0x8a   : > { %2324 = vmatmul.msk.bf16.gmra.mxu3 %vm436_vm0, %v415_v33 }
  0x94   : > { %v542_v35 = vpop.f32.mrf.mxu0 }
  0x95   : > { %v543_v36 = vadd.f32 %v2668_v34, %v542_v35  ;;  %v582_v37 = vpop.f32.mrf.mxu1 }
  0x96   : > { %v583_v38 = vadd.f32 %v2668_v34, %v582_v37 }
  0x97   : > { %v2672_v39 = vmax.f32 %v543_v36, 0.0 }
  0x98   : > { %v2674_v40 = vmax.f32 %v583_v38, 0.0 }
  0x99   : > { %4001 = vst [vmem:[#allocation6_spill] sm:$0xff] %v2672_v39 }
  0x9c   : > { %v622_v41 = vpop.f32.mrf.mxu2  ;;  %v544_v44 = vpop.f32.mrf.mxu0 }
  0x9d   : > { %v623_v42 = vadd.f32 %v2668_v34, %v622_v41  ;;  %v662_v43 = vpop.f32.mrf.mxu3  ;;  %v545_v46 = vadd.f32 %v2668_v34, %v544_v44  ;;  %v584_v47 = vpop.f32.mrf.mxu1 }
  0x9e   : > { %v663_v45 = vadd.f32 %v2668_v34, %v662_v43  ;;  %v585_v49 = vadd.f32 %v2668_v34, %v584_v47 }
  0x9f   : > { %v2679_v48 = vmax.f32 %v623_v42, 0.0  ;;  %v2684_v51 = vmax.f32 %v545_v46, 0.0 }
  0xa0   : > { %v2682_v50 = vmax.f32 %v663_v45, 0.0  ;;  %v2686_v52 = vmax.f32 %v585_v49, 0.0 }
  0xa1   : > { %4003 = vst [vmem:[#allocation8_spill] sm:$0xff] %v2684_v51 }
  0xa2   : > { %4002 = vst [vmem:[#allocation7_spill] sm:$0xff] %v2682_v50 }
  0xa4   : > { %v624_v53 = vpop.f32.mrf.mxu2  ;;  %v547_v56 = vpop.f32.mrf.mxu0 }
  0xa5   : > { %v625_v54 = vadd.f32 %v2668_v34, %v624_v53  ;;  %v664_v55 = vpop.f32.mrf.mxu3  ;;  %v548_v58 = vadd.f32 %v2668_v34, %v547_v56  ;;  %v587_v59 = vpop.f32.mrf.mxu1 }
  0xa6   : > { %v665_v57 = vadd.f32 %v2668_v34, %v664_v55  ;;  %v588_v61 = vadd.f32 %v2668_v34, %v587_v59 }
  0xa7   : > { %v2691_v60 = vmax.f32 %v625_v54, 0.0  ;;  %v2696_v63 = vmax.f32 %v548_v58, 0.0 }
  0xa8   : > { %v2694_v62 = vmax.f32 %v665_v57, 0.0  ;;  %v2698_v0 = vmax.f32 %v588_v61, 0.0 }
  0xa9   : > { %4005 = vst [vmem:[#allocation10_spill] sm:$0xff] %v2696_v63 }
  0xaa   : > { %4004 = vst [vmem:[#allocation9_spill] sm:$0xff] %v2694_v62 }
  0xac   : > { %v627_v1 = vpop.f32.mrf.mxu2  ;;  %v549_v4 = vpop.f32.mrf.mxu0 }
  0xad   : > { %v628_v2 = vadd.f32 %v2668_v34, %v627_v1  ;;  %v667_v3 = vpop.f32.mrf.mxu3  ;;  %v550_v6 = vadd.f32 %v2668_v34, %v549_v4  ;;  %v589_v7 = vpop.f32.mrf.mxu1 }
  0xae   : > { %v668_v5 = vadd.f32 %v2668_v34, %v667_v3  ;;  %v590_v9 = vadd.f32 %v2668_v34, %v589_v7 }
  0xaf   : > { %v2703_v8 = vmax.f32 %v628_v2, 0.0  ;;  %v2708_v11 = vmax.f32 %v550_v6, 0.0 }
  0xb0   : > { %v2706_v10 = vmax.f32 %v668_v5, 0.0  ;;  %v2710_v12 = vmax.f32 %v590_v9, 0.0 }
  0xb1   : > { %4007 = vst [vmem:[#allocation12_spill] sm:$0xff] %v2708_v11 }
  0xb2   : > { %4006 = vst [vmem:[#allocation11_spill] sm:$0xff] %v2706_v10 }
  0xb4   : > { %v629_v13 = vpop.f32.mrf.mxu2  ;;  %v552_v16 = vpop.f32.mrf.mxu0 }
  0xb5   : > { %v630_v14 = vadd.f32 %v2668_v34, %v629_v13  ;;  %v669_v15 = vpop.f32.mrf.mxu3  ;;  %v553_v18 = vadd.f32 %v2668_v34, %v552_v16  ;;  %v592_v19 = vpop.f32.mrf.mxu1 }
  0xb6   : > { %v670_v17 = vadd.f32 %v2668_v34, %v669_v15  ;;  %v593_v21 = vadd.f32 %v2668_v34, %v592_v19 }
  0xb7   : > { %v2715_v20 = vmax.f32 %v630_v14, 0.0  ;;  %v2720_v23 = vmax.f32 %v553_v18, 0.0 }
  0xb8   : > { %v2718_v22 = vmax.f32 %v670_v17, 0.0  ;;  %v2722_v24 = vmax.f32 %v593_v21, 0.0 }
  0xb9   : > { %4009 = vst [vmem:[#allocation14_spill] sm:$0xff] %v2720_v23 }
  0xba   : > { %4008 = vst [vmem:[#allocation13_spill] sm:$0xff] %v2718_v22 }
  0xbc   : > { %v632_v25 = vpop.f32.mrf.mxu2  ;;  %v554_v28 = vpop.f32.mrf.mxu0 }
  0xbd   : > { %v633_v26 = vadd.f32 %v2668_v34, %v632_v25  ;;  %v672_v27 = vpop.f32.mrf.mxu3  ;;  %v555_v30 = vadd.f32 %v2668_v34, %v554_v28  ;;  %v594_v31 = vpop.f32.mrf.mxu1 }
  0xbe   : > { %v673_v29 = vadd.f32 %v2668_v34, %v672_v27  ;;  %v595_v33 = vadd.f32 %v2668_v34, %v594_v31 }
  0xbf   : > { %v2727_v32 = vmax.f32 %v633_v26, 0.0  ;;  %v2732_v36 = vmax.f32 %v555_v30, 0.0 }
  0xc0   : > { %v2730_v35 = vmax.f32 %v673_v29, 0.0  ;;  %v2734_v37 = vmax.f32 %v595_v33, 0.0 }
  0xc2   : > { %4010 = vst [vmem:[#allocation15_spill] sm:$0xff] %v2730_v35 }
  0xc4   : > { %v634_v38 = vpop.f32.mrf.mxu2  ;;  %v557_v43 = vpop.f32.mrf.mxu0 }
  0xc5   : > { %v635_v41 = vadd.f32 %v2668_v34, %v634_v38  ;;  %v674_v42 = vpop.f32.mrf.mxu3  ;;  %v558_v45 = vadd.f32 %v2668_v34, %v557_v43  ;;  %v597_v46 = vpop.f32.mrf.mxu1 }
  0xc6   : > { %v675_v44 = vadd.f32 %v2668_v34, %v674_v42  ;;  %v598_v49 = vadd.f32 %v2668_v34, %v597_v46 }
  0xc7   : > { %v2739_v47 = vmax.f32 %v635_v41, 0.0  ;;  %v2744_v54 = vmax.f32 %v558_v45, 0.0 }
  0xc8   : > { %v2742_v53 = vmax.f32 %v675_v44, 0.0  ;;  %v2746_v55 = vmax.f32 %v598_v49, 0.0 }
  0xca   : > { %4011 = vst [vmem:[#allocation16_spill] sm:$0xff] %v2742_v53 }
  0xcc   : > { %v637_v56 = vpop.f32.mrf.mxu2  ;;  %v559_v59 = vpop.f32.mrf.mxu0 }
  0xcd   : > { %v638_v57 = vadd.f32 %v2668_v34, %v637_v56  ;;  %v677_v58 = vpop.f32.mrf.mxu3  ;;  %v560_v1 = vadd.f32 %v2668_v34, %v559_v59  ;;  %v599_v2 = vpop.f32.mrf.mxu1 }
  0xce   : > { %v678_v61 = vadd.f32 %v2668_v34, %v677_v58  ;;  %v600_v4 = vadd.f32 %v2668_v34, %v599_v2 }
  0xcf   : > { %v2751_v3 = vmax.f32 %v638_v57, 0.0  ;;  %v2756_v6 = vmax.f32 %v560_v1, 0.0 }
  0xd0   : > { %v2754_v5 = vmax.f32 %v678_v61, 0.0  ;;  %v2758_v7 = vmax.f32 %v600_v4, 0.0 }
  0xd2   : > { %4012 = vst [vmem:[#allocation17_spill] sm:$0xff] %v2754_v5 }
  0xd4   : > { %v639_v9 = vpop.f32.mrf.mxu2  ;;  %v562_v15 = vpop.f32.mrf.mxu0 }
  0xd5   : > { %v640_v13 = vadd.f32 %v2668_v34, %v639_v9  ;;  %v679_v14 = vpop.f32.mrf.mxu3  ;;  %v563_v17 = vadd.f32 %v2668_v34, %v562_v15  ;;  %v602_v18 = vpop.f32.mrf.mxu1 }
  0xd6   : > { %v680_v16 = vadd.f32 %v2668_v34, %v679_v14  ;;  %v603_v21 = vadd.f32 %v2668_v34, %v602_v18 }
  0xd7   : > { %v2763_v19 = vmax.f32 %v640_v13, 0.0  ;;  %v2768_v26 = vmax.f32 %v563_v17, 0.0 }
  0xd8   : > { %v2766_v25 = vmax.f32 %v680_v16, 0.0  ;;  %v2770_v27 = vmax.f32 %v603_v21, 0.0 }
  0xda   : > { %4013 = vst [vmem:[#allocation18_spill] sm:$0xff] %v2766_v25 }
  0xdc   : > { %v642_v28 = vpop.f32.mrf.mxu2  ;;  %v564_v31 = vpop.f32.mrf.mxu0 }
  0xdd   : > { %v643_v29 = vadd.f32 %v2668_v34, %v642_v28  ;;  %v682_v30 = vpop.f32.mrf.mxu3  ;;  %v565_v38 = vadd.f32 %v2668_v34, %v564_v31  ;;  %v604_v41 = vpop.f32.mrf.mxu1 }
  0xde   : > { %v683_v33 = vadd.f32 %v2668_v34, %v682_v30  ;;  %v605_v43 = vadd.f32 %v2668_v34, %v604_v41 }
  0xdf   : > { %v2775_v42 = vmax.f32 %v643_v29, 0.0  ;;  %v2780_v45 = vmax.f32 %v565_v38, 0.0 }
  0xe0   : > { %v2778_v44 = vmax.f32 %v683_v33, 0.0  ;;  %v2782_v46 = vmax.f32 %v605_v43, 0.0 }
  0xe2   : > { %4014 = vst [vmem:[#allocation19_spill] sm:$0xff] %v2778_v44 }
  0xe4   : > { %v644_v49 = vpop.f32.mrf.mxu2  ;;  %v567_v58 = vpop.f32.mrf.mxu0 }
  0xe5   : > { %v645_v56 = vadd.f32 %v2668_v34, %v644_v49  ;;  %v684_v57 = vpop.f32.mrf.mxu3  ;;  %v568_v61 = vadd.f32 %v2668_v34, %v567_v58  ;;  %v607_v1 = vpop.f32.mrf.mxu1 }
  0xe6   : > { %v685_v59 = vadd.f32 %v2668_v34, %v684_v57  ;;  %v608_v4 = vadd.f32 %v2668_v34, %v607_v1 }
  0xe7   : > { %v2787_v2 = vmax.f32 %v645_v56, 0.0  ;;  %v2792_v13 = vmax.f32 %v568_v61, 0.0 }
  0xe8   : > { %v2790_v9 = vmax.f32 %v685_v59, 0.0  ;;  %v2794_v14 = vmax.f32 %v608_v4, 0.0 }
  0xea   : > { %4015 = vst [vmem:[#allocation20_spill] sm:$0xff] %v2790_v9 }
  0xec   : > { %v647_v15 = vpop.f32.mrf.mxu2  ;;  %v569_v18 = vpop.f32.mrf.mxu0 }
  0xed   : > { %v648_v16 = vadd.f32 %v2668_v34, %v647_v15  ;;  %v687_v17 = vpop.f32.mrf.mxu3  ;;  %v570_v28 = vadd.f32 %v2668_v34, %v569_v18  ;;  %v609_v29 = vpop.f32.mrf.mxu1 }
  0xee   : > { %v688_v21 = vadd.f32 %v2668_v34, %v687_v17  ;;  %v610_v31 = vadd.f32 %v2668_v34, %v609_v29 }
  0xef   : > { %v2799_v30 = vmax.f32 %v648_v16, 0.0  ;;  %v2804_v38 = vmax.f32 %v570_v28, 0.0 }
  0xf0   : > { %v2802_v33 = vmax.f32 %v688_v21, 0.0  ;;  %v2806_v41 = vmax.f32 %v610_v31, 0.0 }
  0xf2   : > { %4016 = vst [vmem:[#allocation21_spill] sm:$0xff] %v2802_v33 }
  0xf4   : > { %v649_v43 = vpop.f32.mrf.mxu2  ;;  %v572_v57 = vpop.f32.mrf.mxu0 }
  0xf5   : > { %v650_v49 = vadd.f32 %v2668_v34, %v649_v43  ;;  %v689_v56 = vpop.f32.mrf.mxu3  ;;  %v573_v59 = vadd.f32 %v2668_v34, %v572_v57  ;;  %v612_v61 = vpop.f32.mrf.mxu1 }
  0xf6   : > { %v690_v58 = vadd.f32 %v2668_v34, %v689_v56  ;;  %v613_v4 = vadd.f32 %v2668_v34, %v612_v61 }
  0xf7   : > { %v2811_v1 = vmax.f32 %v650_v49, 0.0  ;;  %v2816_v16 = vmax.f32 %v573_v59, 0.0 }
  0xf8   : > { %v2814_v15 = vmax.f32 %v690_v58, 0.0  ;;  %v2818_v17 = vmax.f32 %v613_v4, 0.0 }
  0xfa   : > { %4017 = vst [vmem:[#allocation22_spill] sm:$0xff] %v2814_v15 }
  0xfc   : > { %v652_v18 = vpop.f32.mrf.mxu2  ;;  %v574_v29 = vpop.f32.mrf.mxu0 }
  0xfd   : > { %v653_v21 = vadd.f32 %v2668_v34, %v652_v18  ;;  %v692_v28 = vpop.f32.mrf.mxu3  ;;  %v575_v43 = vadd.f32 %v2668_v34, %v574_v29  ;;  %v614_v56 = vpop.f32.mrf.mxu1 }
  0xfe   : > { %v693_v31 = vadd.f32 %v2668_v34, %v692_v28  ;;  %v615_v57 = vadd.f32 %v2668_v34, %v614_v56 }
  0xff   : > { %v2823_v49 = vmax.f32 %v653_v21, 0.0  ;;  %v2828_v59 = vmax.f32 %v575_v43, 0.0 }
 0x100   : > { %v2826_v58 = vmax.f32 %v693_v31, 0.0  ;;  %v2830_v61 = vmax.f32 %v615_v57, 0.0 }
 0x101   : > { %4018 = vst [vmem:[#allocation23_spill] sm:$0xff] %v2823_v49 }
 0x102   : > { %4019 = vst [vmem:[#allocation24_spill] sm:$0xff] %v2826_v58 }
 0x104   : > { %v654_v4 = vpop.f32.mrf.mxu2  ;;  %v577_v33 = vpop.f32.mrf.mxu0 }
 0x105   : > { %v655_v18 = vadd.f32 %v2668_v34, %v654_v4  ;;  %v694_v15 = vpop.f32.mrf.mxu3  ;;  %v578_v29 = vadd.f32 %v2668_v34, %v577_v33  ;;  %v617_v9 = vpop.f32.mrf.mxu1 }
 0x106   : > { %v695_v28 = vadd.f32 %v2668_v34, %v694_v15  ;;  %v618_v56 = vadd.f32 %v2668_v34, %v617_v9 }
 0x107   : > { %v2835_v21 = vmax.f32 %v655_v18, 0.0  ;;  %v2840_v43 = vmax.f32 %v578_v29, 0.0 }
 0x108   : > { %v2838_v31 = vmax.f32 %v695_v28, 0.0  ;;  %v2842_v57 = vmax.f32 %v618_v56, 0.0 }
 0x109   : > { %4020 = vst [vmem:[#allocation25_spill] sm:$0xff] %v2835_v21 }
 0x10a   : > { %4021 = vst [vmem:[#allocation26_spill] sm:$0xff] %v2838_v31 }
 0x10c   : > { %v657_v58 = vpop.f32.mrf.mxu2  ;;  %v579_v25 = vpop.f32.mrf.mxu0 }
 0x10d   : > { %v658_v4 = vadd.f32 %v2668_v34, %v657_v58  ;;  %v697_v44 = vpop.f32.mrf.mxu3  ;;  %v580_v33 = vadd.f32 %v2668_v34, %v579_v25  ;;  %v619_v5 = vpop.f32.mrf.mxu1 }
 0x10e   : > { %v698_v15 = vadd.f32 %v2668_v34, %v697_v44  ;;  %v620_v9 = vadd.f32 %v2668_v34, %v619_v5 }
 0x10f   : > { %v2847_v18 = vmax.f32 %v658_v4, 0.0  ;;  %v2852_v29 = vmax.f32 %v580_v33, 0.0 }
 0x110   : > { %v2850_v28 = vmax.f32 %v698_v15, 0.0  ;;  %v2854_v56 = vmax.f32 %v620_v9, 0.0 }
 0x111   : > { %4022 = vst [vmem:[#allocation27_spill] sm:$0xff] %v2847_v18 }
 0x112   : > { %4023 = vst [vmem:[#allocation28_spill] sm:$0xff] %v2850_v28 }
 0x114   : > { %v659_v31 = vpop.f32.mrf.mxu2 }
 0x115   : > { %v660_v58 = vadd.f32 %v2668_v34, %v659_v31  ;;  %v699_v53 = vpop.f32.mrf.mxu3 }
 0x116   : > { %v700_v35 = vadd.f32 %v2668_v34, %v699_v53  ;;  %769 = sbr.rel (%p2325_p7) target bundleno = 602 (0x25a), region = 52 }
 0x117   : > { %v2858_v44 = vmax.f32 %v660_v58, 0.0 }
 0x118   : > { %v2860_v25 = vmax.f32 %v700_v35, 0.0 }
 0x119   : > { %4024 = vst [vmem:[#allocation29_spill] sm:$0xff] %v2858_v44 }
 0x11a   : > { %4025 = vst [vmem:[#allocation30_spill] sm:$0xff] %v2860_v25 }
 0x11b   : > { %773 = sbr.rel (%p2326_p8) target bundleno = 291 (0x123), region = 56 }
 0x120   : > { %vm774_vm1 = vcmask 253952   ;;  %v2475_v5 = vmov 0.0  }
 0x121   : > { %775 = vst.msk [vmem:[#allocation2] sm:$0x1] %vm774_vm1, %v2475_v5 }
 0x122   : > { %776 = vst.msk [vmem:[#allocation3] sm:$0x1] %vm774_vm1, %v2475_v5 }
 0x123 PF: > { %p2327_p9 = scmp.ge.s32.totalorder %s2457_s24, 1 }
 0x125   : > { %780 = sbr.rel (%p2327_p9) target bundleno = 450 (0x1c2), region = 60 }
 0x12a   : > { %v782_v34 = vsel %vm436_vm0, %v2672_v39, 0.0  ;;  %v783_v35 = vsel %vm436_vm0, %v2684_v51, 0.0  ;;  %v785_v53 = vsel %vm436_vm0, %v2696_v63, 0.0  ;;  %v787_v4 = vsel %vm436_vm0, %v2708_v11, 0.0 }
 0x12b   : > { %v784_v31 = vadd.f32 %v783_v35, %v782_v34  ;;  %v789_v33 = vsel %vm436_vm0, %v2720_v23, 0.0  ;;  %v791_v58 = vsel %vm436_vm0, %v2732_v36, 0.0  ;;  %v793_v25 = vsel %vm436_vm0, %v2744_v54, 0.0 }
 0x12c   : > { %v919_v28 = vmul.f32 %v2672_v39, %v2672_v39  ;;  %v920_v34 = vmul.f32 %v2684_v51, %v2684_v51  ;;  %v921_v35 = vmul.f32 %v2696_v63, %v2696_v63  ;;  %v799_v51 = vsel %vm436_vm0, %v2780_v45, 0.0 }
 0x12d   : > { %v786_v15 = vadd.f32 %v785_v53, %v784_v31  ;;  %v795_v53 = vsel %vm436_vm0, %v2756_v6, 0.0  ;;  %vm916_vm2 = vcmask 253952  }
 0x12e   : > { %v986_v63 = vsel %vm436_vm0, %v921_v35, 0.0 }
 0x12f   : > { %v788_v9 = vadd.f32 %v787_v4, %v786_v15  ;;  %v922_v4 = vmul.f32 %v2708_v11, %v2708_v11  ;;  %v797_v15 = vsel %vm436_vm0, %v2768_v26, 0.0  ;;  %v924_v11 = vmul.f32 %v2732_v36, %v2732_v36 }
 0x131   : > { %v790_v5 = vadd.f32 %v789_v33, %v788_v9  ;;  %v983_v33 = vsel %vm436_vm0, %v919_v28, 0.0  ;;  %v988_v39 = vsel %vm436_vm0, %v922_v4, 0.0  ;;  %v801_v28 = vsel %vm436_vm0, %v2792_v13, 0.0 }
 0x132   : > { %v992_v4 = vsel %vm436_vm0, %v924_v11, 0.0 }
 0x133   : > { %v792_v22 = vadd.f32 %v791_v58, %v790_v5  ;;  %v923_v58 = vmul.f32 %v2720_v23, %v2720_v23  ;;  %v984_v5 = vsel %vm436_vm0, %v920_v34, 0.0  ;;  %v925_v34 = vmul.f32 %v2744_v54, %v2744_v54 }
 0x134   : > { %v803_v23 = vsel %vm436_vm0, %v2804_v38, 0.0 }
 0x135   : > { %v794_v31 = vadd.f32 %v793_v25, %v792_v22  ;;  %v985_v22 = vadd.f32 %v984_v5, %v983_v33  ;;  %v990_v35 = vsel %vm436_vm0, %v923_v58, 0.0  ;;  %v805_v5 = vsel %vm436_vm0, %v2816_v16, 0.0 }
 0x136   : > { %v994_v58 = vsel %vm436_vm0, %v925_v34, 0.0 }
 0x137   : > { %v796_v9 = vadd.f32 %v795_v53, %v794_v31  ;;  %v987_v53 = vadd.f32 %v986_v63, %v985_v22  ;;  %v927_v22 = vmul.f32 %v2768_v26, %v2768_v26 }
 0x139   : > { %v798_v25 = vadd.f32 %v797_v15, %v796_v9  ;;  %v989_v33 = vadd.f32 %v988_v39, %v987_v53  ;;  %v926_v9 = vmul.f32 %v2756_v6, %v2756_v6  ;;  %v928_v53 = vmul.f32 %v2780_v45, %v2780_v45 }
 0x13a   : > { %v998_v34 = vsel %vm436_vm0, %v927_v22, 0.0 }
 0x13b   : > { %v800_v31 = vadd.f32 %v799_v51, %v798_v25  ;;  %v991_v63 = vadd.f32 %v990_v35, %v989_v33  ;;  %v807_v25 = vsel %vm436_vm0, %v2828_v59, 0.0  ;;  %v996_v11 = vsel %vm436_vm0, %v926_v9, 0.0 }
 0x13c   : > { %v929_v33 = vmul.f32 %v2792_v13, %v2792_v13  ;;  %v1000_v9 = vsel %vm436_vm0, %v928_v53, 0.0 }
 0x13d   : > { %v802_v15 = vadd.f32 %v801_v28, %v800_v31  ;;  %v993_v39 = vadd.f32 %v992_v4, %v991_v63  ;;  %v809_v31 = vsel %vm436_vm0, %v2840_v43, 0.0  ;;  %v930_v63 = vmul.f32 %v2804_v38, %v2804_v38 }
 0x13e   : > { %v1002_v22 = vsel %vm436_vm0, %v929_v33, 0.0 }
 0x13f   : > { %v804_v51 = vadd.f32 %v803_v23, %v802_v15  ;;  %v995_v35 = vadd.f32 %v994_v58, %v993_v39  ;;  %v811_v15 = vsel %vm436_vm0, %v2852_v29, 0.0  ;;  %v931_v39 = vmul.f32 %v2816_v16, %v2816_v16 }
 0x140   : > { %v1004_v53 = vsel %vm436_vm0, %v930_v63, 0.0 }
 0x141   : > { %v806_v28 = vadd.f32 %v805_v5, %v804_v51  ;;  %v997_v4 = vadd.f32 %v996_v11, %v995_v35  ;;  %v813_v51 = vsel %vm436_vm0, %v2674_v40, 0.0  ;;  %v932_v35 = vmul.f32 %v2828_v59, %v2828_v59 }
 0x142   : > { %v1006_v33 = vsel %vm436_vm0, %v931_v39, 0.0 }
 0x143   : > { %v808_v23 = vadd.f32 %v807_v25, %v806_v28  ;;  %v999_v58 = vadd.f32 %v998_v34, %v997_v4  ;;  %v815_v28 = vsel %vm436_vm0, %v2686_v52, 0.0  ;;  %v933_v4 = vmul.f32 %v2840_v43, %v2840_v43 }
 0x144   : > { %v1008_v63 = vsel %vm436_vm0, %v932_v35, 0.0 }
 0x145   : > { %v810_v5 = vadd.f32 %v809_v31, %v808_v23  ;;  %v1001_v11 = vadd.f32 %v1000_v9, %v999_v58  ;;  %v817_v23 = vsel %vm436_vm0, %v2698_v0, 0.0  ;;  %v934_v58 = vmul.f32 %v2852_v29, %v2852_v29 }
 0x146   : > { %v1010_v39 = vsel %vm436_vm0, %v933_v4, 0.0 }
 0x147   : > { %v812_v25 = vadd.f32 %v811_v15, %v810_v5  ;;  %v1003_v34 = vadd.f32 %v1002_v22, %v1001_v11  ;;  %v819_v5 = vsel %vm436_vm0, %v2710_v12, 0.0  ;;  %v935_v11 = vmul.f32 %v2674_v40, %v2674_v40 }
 0x148   : > { %v1012_v35 = vsel %vm436_vm0, %v934_v58, 0.0 }
 0x149   : > { %v814_v31 = vadd.f32 %v813_v51, %v812_v25  ;;  %v1005_v9 = vadd.f32 %v1004_v53, %v1003_v34  ;;  %v821_v25 = vsel %vm436_vm0, %v2722_v24, 0.0  ;;  %v936_v34 = vmul.f32 %v2686_v52, %v2686_v52 }
 0x14a   : > { %v1014_v4 = vsel %vm436_vm0, %v935_v11, 0.0 }
 0x14b   : > { %v816_v15 = vadd.f32 %v815_v28, %v814_v31  ;;  %v1007_v22 = vadd.f32 %v1006_v33, %v1005_v9  ;;  %v823_v31 = vsel %vm436_vm0, %v2734_v37, 0.0  ;;  %v937_v9 = vmul.f32 %v2698_v0, %v2698_v0 }
 0x14c   : > { %v1016_v58 = vsel %vm436_vm0, %v936_v34, 0.0 }
 0x14d   : > { %v818_v51 = vadd.f32 %v817_v23, %v816_v15  ;;  %v1009_v53 = vadd.f32 %v1008_v63, %v1007_v22  ;;  %v825_v15 = vsel %vm436_vm0, %v2746_v55, 0.0  ;;  %v938_v22 = vmul.f32 %v2710_v12, %v2710_v12 }
 0x14e   : > { %v1018_v11 = vsel %vm436_vm0, %v937_v9, 0.0 }
 0x14f   : > { %v820_v28 = vadd.f32 %v819_v5, %v818_v51  ;;  %v1011_v33 = vadd.f32 %v1010_v39, %v1009_v53  ;;  %v827_v51 = vsel %vm436_vm0, %v2758_v7, 0.0  ;;  %v939_v53 = vmul.f32 %v2722_v24, %v2722_v24 }
 0x150   : > { %v1020_v34 = vsel %vm436_vm0, %v938_v22, 0.0 }
 0x151   : > { %v822_v23 = vadd.f32 %v821_v25, %v820_v28  ;;  %v1013_v63 = vadd.f32 %v1012_v35, %v1011_v33  ;;  %v829_v28 = vsel %vm436_vm0, %v2770_v27, 0.0  ;;  %v940_v33 = vmul.f32 %v2734_v37, %v2734_v37 }
 0x152   : > { %v1022_v9 = vsel %vm436_vm0, %v939_v53, 0.0 }
 0x153   : > { %v824_v5 = vadd.f32 %v823_v31, %v822_v23  ;;  %v1015_v39 = vadd.f32 %v1014_v4, %v1013_v63  ;;  %v831_v23 = vsel %vm436_vm0, %v2782_v46, 0.0  ;;  %v941_v63 = vmul.f32 %v2746_v55, %v2746_v55 }
 0x154   : > { %v1024_v22 = vsel %vm436_vm0, %v940_v33, 0.0 }
 0x155   : > { %v826_v25 = vadd.f32 %v825_v15, %v824_v5  ;;  %v1017_v35 = vadd.f32 %v1016_v58, %v1015_v39  ;;  %v833_v5 = vsel %vm436_vm0, %v2794_v14, 0.0  ;;  %v942_v39 = vmul.f32 %v2758_v7, %v2758_v7 }
 0x156   : > { %v1026_v53 = vsel %vm436_vm0, %v941_v63, 0.0 }
 0x157   : > { %v828_v31 = vadd.f32 %v827_v51, %v826_v25  ;;  %v1019_v4 = vadd.f32 %v1018_v11, %v1017_v35  ;;  %v835_v25 = vsel %vm436_vm0, %v2806_v41, 0.0  ;;  %v943_v35 = vmul.f32 %v2770_v27, %v2770_v27 }
 0x158   : > { %v1028_v33 = vsel %vm436_vm0, %v942_v39, 0.0 }
 0x159   : > { %v830_v15 = vadd.f32 %v829_v28, %v828_v31  ;;  %v1021_v58 = vadd.f32 %v1020_v34, %v1019_v4  ;;  %v837_v31 = vsel %vm436_vm0, %v2818_v17, 0.0  ;;  %v944_v4 = vmul.f32 %v2782_v46, %v2782_v46 }
 0x15a   : > { %v1030_v63 = vsel %vm436_vm0, %v943_v35, 0.0 }
 0x15b   : > { %v832_v51 = vadd.f32 %v831_v23, %v830_v15  ;;  %v1023_v11 = vadd.f32 %v1022_v9, %v1021_v58  ;;  %v839_v15 = vsel %vm436_vm0, %v2830_v61, 0.0  ;;  %v945_v58 = vmul.f32 %v2794_v14, %v2794_v14 }
 0x15c   : > { %v1032_v39 = vsel %vm436_vm0, %v944_v4, 0.0 }
 0x15d   : > { %v834_v28 = vadd.f32 %v833_v5, %v832_v51  ;;  %v1025_v34 = vadd.f32 %v1024_v22, %v1023_v11  ;;  %v841_v51 = vsel %vm436_vm0, %v2842_v57, 0.0  ;;  %v946_v11 = vmul.f32 %v2806_v41, %v2806_v41 }
 0x15e   : > { %v1034_v35 = vsel %vm436_vm0, %v945_v58, 0.0 }
 0x15f   : > { %v836_v23 = vadd.f32 %v835_v25, %v834_v28  ;;  %v1027_v9 = vadd.f32 %v1026_v53, %v1025_v34  ;;  %v843_v28 = vsel %vm436_vm0, %v2854_v56, 0.0  ;;  %v947_v34 = vmul.f32 %v2818_v17, %v2818_v17 }
 0x160   : > { %v1036_v4 = vsel %vm436_vm0, %v946_v11, 0.0 }
 0x161   : > { %v838_v5 = vadd.f32 %v837_v31, %v836_v23  ;;  %v1029_v22 = vadd.f32 %v1028_v33, %v1027_v9  ;;  %v845_v23 = vsel %vm436_vm0, %v2679_v48, 0.0  ;;  %v948_v9 = vmul.f32 %v2830_v61, %v2830_v61 }
 0x162   : > { %v1038_v58 = vsel %vm436_vm0, %v947_v34, 0.0 }
 0x163   : > { %v840_v25 = vadd.f32 %v839_v15, %v838_v5  ;;  %v1031_v53 = vadd.f32 %v1030_v63, %v1029_v22  ;;  %v847_v5 = vsel %vm436_vm0, %v2691_v60, 0.0  ;;  %v949_v22 = vmul.f32 %v2842_v57, %v2842_v57 }
 0x164   : > { %v1040_v11 = vsel %vm436_vm0, %v948_v9, 0.0 }
 0x165   : > { %v842_v31 = vadd.f32 %v841_v51, %v840_v25  ;;  %v1033_v33 = vadd.f32 %v1032_v39, %v1031_v53  ;;  %v849_v25 = vsel %vm436_vm0, %v2703_v8, 0.0  ;;  %v950_v53 = vmul.f32 %v2854_v56, %v2854_v56 }
 0x166   : > { %v1042_v34 = vsel %vm436_vm0, %v949_v22, 0.0 }
 0x167   : > { %v844_v15 = vadd.f32 %v843_v28, %v842_v31  ;;  %v1035_v63 = vadd.f32 %v1034_v35, %v1033_v33  ;;  %v851_v31 = vsel %vm436_vm0, %v2715_v20, 0.0  ;;  %v951_v33 = vmul.f32 %v2679_v48, %v2679_v48 }
 0x168   : > { %v1044_v9 = vsel %vm436_vm0, %v950_v53, 0.0 }
 0x169   : > { %v846_v51 = vadd.f32 %v845_v23, %v844_v15  ;;  %v1037_v39 = vadd.f32 %v1036_v4, %v1035_v63  ;;  %v853_v15 = vsel %vm436_vm0, %v2727_v32, 0.0  ;;  %v952_v63 = vmul.f32 %v2691_v60, %v2691_v60 }
 0x16a   : > { %v1046_v22 = vsel %vm436_vm0, %v951_v33, 0.0 }
 0x16b   : > { %v848_v28 = vadd.f32 %v847_v5, %v846_v51  ;;  %v1039_v35 = vadd.f32 %v1038_v58, %v1037_v39  ;;  %v855_v51 = vsel %vm436_vm0, %v2739_v47, 0.0  ;;  %v953_v39 = vmul.f32 %v2703_v8, %v2703_v8 }
 0x16c   : > { %v1048_v53 = vsel %vm436_vm0, %v952_v63, 0.0 }
 0x16d   : > { %v850_v23 = vadd.f32 %v849_v25, %v848_v28  ;;  %v1041_v4 = vadd.f32 %v1040_v11, %v1039_v35  ;;  %v857_v28 = vsel %vm436_vm0, %v2751_v3, 0.0  ;;  %v954_v35 = vmul.f32 %v2715_v20, %v2715_v20 }
 0x16e   : > { %v1050_v33 = vsel %vm436_vm0, %v953_v39, 0.0 }
 0x16f   : > { %v852_v5 = vadd.f32 %v851_v31, %v850_v23  ;;  %v1043_v58 = vadd.f32 %v1042_v34, %v1041_v4  ;;  %v859_v23 = vsel %vm436_vm0, %v2763_v19, 0.0  ;;  %v955_v4 = vmul.f32 %v2727_v32, %v2727_v32 }
 0x170   : > { %v1052_v63 = vsel %vm436_vm0, %v954_v35, 0.0 }
 0x171   : > { %v854_v25 = vadd.f32 %v853_v15, %v852_v5  ;;  %v1045_v11 = vadd.f32 %v1044_v9, %v1043_v58  ;;  %v861_v5 = vsel %vm436_vm0, %v2775_v42, 0.0  ;;  %v956_v58 = vmul.f32 %v2739_v47, %v2739_v47 }
 0x172   : > { %v1054_v39 = vsel %vm436_vm0, %v955_v4, 0.0 }
 0x173   : > { %v856_v31 = vadd.f32 %v855_v51, %v854_v25  ;;  %v1047_v34 = vadd.f32 %v1046_v22, %v1045_v11  ;;  %v863_v25 = vsel %vm436_vm0, %v2787_v2, 0.0  ;;  %v957_v11 = vmul.f32 %v2751_v3, %v2751_v3 }
 0x174   : > { %v1056_v35 = vsel %vm436_vm0, %v956_v58, 0.0 }
 0x175   : > { %v858_v15 = vadd.f32 %v857_v28, %v856_v31  ;;  %v1049_v9 = vadd.f32 %v1048_v53, %v1047_v34  ;;  %v865_v31 = vsel %vm436_vm0, %v2799_v30, 0.0  ;;  %v958_v34 = vmul.f32 %v2763_v19, %v2763_v19 }
 0x176   : > { %v1058_v4 = vsel %vm436_vm0, %v957_v11, 0.0 }
 0x177   : > { %v860_v51 = vadd.f32 %v859_v23, %v858_v15  ;;  %v1051_v22 = vadd.f32 %v1050_v33, %v1049_v9  ;;  %v867_v15 = vsel %vm436_vm0, %v2811_v1, 0.0  ;;  %v959_v9 = vmul.f32 %v2775_v42, %v2775_v42 }
 0x178   : > { %v1060_v58 = vsel %vm436_vm0, %v958_v34, 0.0 }
 0x179   : > { %v862_v28 = vadd.f32 %v861_v5, %v860_v51  ;;  %v1053_v53 = vadd.f32 %v1052_v63, %v1051_v22  ;;  %v869_v51 = vsel %vm436_vm0, %v2823_v49, 0.0  ;;  %v960_v22 = vmul.f32 %v2787_v2, %v2787_v2 }
 0x17a   : > { %v1062_v11 = vsel %vm436_vm0, %v959_v9, 0.0 }
 0x17b   : > { %v864_v23 = vadd.f32 %v863_v25, %v862_v28  ;;  %v1055_v33 = vadd.f32 %v1054_v39, %v1053_v53  ;;  %v871_v28 = vsel %vm436_vm0, %v2835_v21, 0.0  ;;  %v961_v53 = vmul.f32 %v2799_v30, %v2799_v30 }
 0x17c   : > { %v1064_v34 = vsel %vm436_vm0, %v960_v22, 0.0 }
 0x17d   : > { %v866_v5 = vadd.f32 %v865_v31, %v864_v23  ;;  %v1057_v63 = vadd.f32 %v1056_v35, %v1055_v33  ;;  %v873_v23 = vsel %vm436_vm0, %v2847_v18, 0.0  ;;  %v962_v33 = vmul.f32 %v2811_v1, %v2811_v1 }
 0x17e   : > { %v1066_v9 = vsel %vm436_vm0, %v961_v53, 0.0 }
 0x17f   : > { %v868_v25 = vadd.f32 %v867_v15, %v866_v5  ;;  %v1059_v39 = vadd.f32 %v1058_v4, %v1057_v63  ;;  %v875_v5 = vsel %vm436_vm0, %v2858_v44, 0.0  ;;  %v963_v63 = vmul.f32 %v2823_v49, %v2823_v49 }
 0x180   : > { %v1068_v22 = vsel %vm436_vm0, %v962_v33, 0.0 }
 0x181   : > { %v870_v31 = vadd.f32 %v869_v51, %v868_v25  ;;  %v1061_v35 = vadd.f32 %v1060_v58, %v1059_v39  ;;  %v877_v25 = vsel %vm436_vm0, %v2682_v50, 0.0  ;;  %v964_v39 = vmul.f32 %v2835_v21, %v2835_v21 }
 0x182   : > { %v1070_v53 = vsel %vm436_vm0, %v963_v63, 0.0 }
 0x183   : > { %v872_v15 = vadd.f32 %v871_v28, %v870_v31  ;;  %v1063_v4 = vadd.f32 %v1062_v11, %v1061_v35  ;;  %v879_v31 = vsel %vm436_vm0, %v2694_v62, 0.0  ;;  %v965_v35 = vmul.f32 %v2847_v18, %v2847_v18 }
 0x184   : > { %v1072_v33 = vsel %vm436_vm0, %v964_v39, 0.0 }
 0x185   : > { %v874_v51 = vadd.f32 %v873_v23, %v872_v15  ;;  %v1065_v58 = vadd.f32 %v1064_v34, %v1063_v4  ;;  %v881_v15 = vsel %vm436_vm0, %v2706_v10, 0.0  ;;  %v966_v4 = vmul.f32 %v2858_v44, %v2858_v44 }
 0x186   : > { %v1074_v63 = vsel %vm436_vm0, %v965_v35, 0.0 }
 0x187   : > { %v876_v28 = vadd.f32 %v875_v5, %v874_v51  ;;  %v1067_v11 = vadd.f32 %v1066_v9, %v1065_v58  ;;  %v4026_v51 = vld [vmem:[#allocation13_spill] sm:$0xff]  ;;  %v967_v58 = vmul.f32 %v2682_v50, %v2682_v50  ;;  %v1076_v39 = vsel %vm436_vm0, %v966_v4, 0.0 }
 0x188   : > { %v883_v49 = vsel %vm436_vm0, %v4026_v51, 0.0 }
 0x189   : > { %v878_v23 = vadd.f32 %v877_v25, %v876_v28  ;;  %v1069_v34 = vadd.f32 %v1068_v22, %v1067_v11  ;;  %v4027_v28 = vld [vmem:[#allocation15_spill] sm:$0xff]  ;;  %v968_v11 = vmul.f32 %v2694_v62, %v2694_v62  ;;  %v1078_v35 = vsel %vm436_vm0, %v967_v58, 0.0 }
 0x18a   : > { %v885_v21 = vsel %vm436_vm0, %v4027_v28, 0.0 }
 0x18b   : > { %v880_v5 = vadd.f32 %v879_v31, %v878_v23  ;;  %v1071_v9 = vadd.f32 %v1070_v53, %v1069_v34  ;;  %v4028_v23 = vld [vmem:[#allocation16_spill] sm:$0xff]  ;;  %v969_v34 = vmul.f32 %v2706_v10, %v2706_v10  ;;  %v1080_v4 = vsel %vm436_vm0, %v968_v11, 0.0 }
 0x18c   : > { %v887_v18 = vsel %vm436_vm0, %v4028_v23, 0.0 }
 0x18d   : > { %v882_v25 = vadd.f32 %v881_v15, %v880_v5  ;;  %v1073_v22 = vadd.f32 %v1072_v33, %v1071_v9  ;;  %v4029_v5 = vld [vmem:[#allocation17_spill] sm:$0xff]  ;;  %v970_v9 = vmul.f32 %v4026_v51, %v4026_v51  ;;  %v1082_v58 = vsel %vm436_vm0, %v969_v34, 0.0 }
 0x18e   : > { %v889_v44 = vsel %vm436_vm0, %v4029_v5, 0.0  ;;  %v972_v51 = vmul.f32 %v4028_v23, %v4028_v23 }
 0x18f   : > { %v884_v31 = vadd.f32 %v883_v49, %v882_v25  ;;  %v1075_v53 = vadd.f32 %v1074_v63, %v1073_v22  ;;  %v4030_v25 = vld [vmem:[#allocation18_spill] sm:$0xff]  ;;  %v971_v22 = vmul.f32 %v4027_v28, %v4027_v28  ;;  %v1084_v11 = vsel %vm436_vm0, %v970_v9, 0.0 }
 0x190   : > { %v891_v50 = vsel %vm436_vm0, %v4030_v25, 0.0  ;;  %v973_v28 = vmul.f32 %v4029_v5, %v4029_v5  ;;  %v974_v23 = vmul.f32 %v4030_v25, %v4030_v25  ;;  %v1088_v9 = vsel %vm436_vm0, %v972_v51, 0.0 }
 0x191   : > { %v886_v15 = vadd.f32 %v885_v21, %v884_v31  ;;  %v1077_v33 = vadd.f32 %v1076_v39, %v1075_v53  ;;  %v4031_v31 = vld [vmem:[#allocation19_spill] sm:$0xff]  ;;  %v4033_v53 = vld [vmem:[#allocation21_spill] sm:$0xff]  ;;  %v1086_v34 = vsel %vm436_vm0, %v971_v22, 0.0 }
 0x192   : > { %v893_v62 = vsel %vm436_vm0, %v4031_v31, 0.0  ;;  %v975_v5 = vmul.f32 %v4031_v31, %v4031_v31  ;;  %v1090_v22 = vsel %vm436_vm0, %v973_v28, 0.0  ;;  %v1092_v51 = vsel %vm436_vm0, %v974_v23, 0.0 }
 0x193   : > { %v888_v49 = vadd.f32 %v887_v18, %v886_v15  ;;  %v1079_v63 = vadd.f32 %v1078_v35, %v1077_v33  ;;  %v4032_v15 = vld [vmem:[#allocation20_spill] sm:$0xff]  ;;  %v4034_v33 = vld [vmem:[#allocation22_spill] sm:$0xff]  ;;  %v977_v31 = vmul.f32 %v4033_v53, %v4033_v53 }
 0x194   : > { %v895_v10 = vsel %vm436_vm0, %v4032_v15, 0.0  ;;  %v976_v25 = vmul.f32 %v4032_v15, %v4032_v15  ;;  %v1094_v28 = vsel %vm436_vm0, %v975_v5, 0.0  ;;  %v978_v15 = vmul.f32 %v4034_v33, %v4034_v33 }
 0x195   : > { %v890_v21 = vadd.f32 %v889_v44, %v888_v49  ;;  %v1081_v39 = vadd.f32 %v1080_v4, %v1079_v63  ;;  %v897_v49 = vsel %vm436_vm0, %v4033_v53, 0.0  ;;  %v4035_v63 = vld [vmem:[#allocation24_spill] sm:$0xff] }
 0x196   : > { %v1096_v23 = vsel %vm436_vm0, %v976_v25, 0.0 }
 0x197   : > { %v892_v18 = vadd.f32 %v891_v50, %v890_v21  ;;  %v1083_v35 = vadd.f32 %v1082_v58, %v1081_v39  ;;  %v899_v21 = vsel %vm436_vm0, %v4034_v33, 0.0  ;;  %v4036_v39 = vld [vmem:[#allocation26_spill] sm:$0xff] }
 0x198   : > { %v980_v5 = vmul.f32 %v4036_v39, %v4036_v39 }
 0x199   : > { %v894_v44 = vadd.f32 %v893_v62, %v892_v18  ;;  %v1085_v4 = vadd.f32 %v1084_v11, %v1083_v35  ;;  %v901_v18 = vsel %vm436_vm0, %v4035_v63, 0.0  ;;  %v4037_v35 = vld [vmem:[#allocation28_spill] sm:$0xff] }
 0x19a   : > { %v981_v33 = vmul.f32 %v4037_v35, %v4037_v35 }
 0x19b   : > { %v896_v50 = vadd.f32 %v895_v10, %v894_v44  ;;  %v1087_v58 = vadd.f32 %v1086_v34, %v1085_v4  ;;  %v903_v44 = vsel %vm436_vm0, %v4036_v39, 0.0  ;;  %v4038_v4 = vld [vmem:[#allocation30_spill] sm:$0xff] }
 0x19c   : > { %v1106_v39 = vsel %vm436_vm0, %v981_v33, 0.0 }
 0x19d   : > { %v898_v62 = vadd.f32 %v897_v49, %v896_v50  ;;  %v1089_v11 = vadd.f32 %v1088_v9, %v1087_v58  ;;  %v905_v50 = vsel %vm436_vm0, %v4037_v35, 0.0 }
 0x19f   : > { %v900_v10 = vadd.f32 %v899_v21, %v898_v62  ;;  %v1091_v34 = vadd.f32 %v1090_v22, %v1089_v11  ;;  %v907_v62 = vsel %vm436_vm0, %v4038_v4, 0.0  ;;  %v979_v22 = vmul.f32 %v4035_v63, %v4035_v63 }
 0x1a0   : > { %v982_v63 = vmul.f32 %v4038_v4, %v4038_v4 }
 0x1a1   : > { %v902_v49 = vadd.f32 %v901_v18, %v900_v10  ;;  %v1093_v9 = vadd.f32 %v1092_v51, %v1091_v34  ;;  %v1102_v25 = vsel %vm436_vm0, %v979_v22, 0.0 }
 0x1a3   : > { %v904_v21 = vadd.f32 %v903_v44, %v902_v49  ;;  %v1095_v58 = vadd.f32 %v1094_v28, %v1093_v9  ;;  %v1098_v44 = vsel %vm436_vm0, %v977_v31, 0.0  ;;  %v1100_v49 = vsel %vm436_vm0, %v978_v15, 0.0 }
 0x1a4   : > { %v1104_v31 = vsel %vm436_vm0, %v980_v5, 0.0  ;;  %v1108_v15 = vsel %vm436_vm0, %v982_v63, 0.0 }
 0x1a5   : > { %v906_v18 = vadd.f32 %v905_v50, %v904_v21  ;;  %v1097_v53 = vadd.f32 %v1096_v23, %v1095_v58  ;;  %v781_v23 = vld [vmem:[#allocation2] sm:$0x1] }
 0x1a7   : > { %v908_v10 = vadd.f32 %v907_v62, %v906_v18  ;;  %v1099_v51 = vadd.f32 %v1098_v44, %v1097_v53 }
 0x1a9   : > { %v909_v11 = vrot.slane %v908_v10, 4  ;;  %v1101_v34 = vadd.f32 %v1100_v49, %v1099_v51  ;;  %v918_v49 = vld [vmem:[#allocation3] sm:$0x1] }
 0x1ab   : > { %v910_v50 = vadd.f32 %v909_v11, %v908_v10  ;;  %v1103_v28 = vadd.f32 %v1102_v25, %v1101_v34 }
 0x1ad   : > { %v911_v21 = vrot.slane %v910_v50, 2  ;;  %v1105_v9 = vadd.f32 %v1104_v31, %v1103_v28 }
 0x1af   : > { %v912_v62 = vadd.f32 %v911_v21, %v910_v50  ;;  %v1107_v58 = vadd.f32 %v1106_v39, %v1105_v9 }
 0x1b1   : > { %v913_v18 = vrot.slane %v912_v62, 1  ;;  %v1109_v10 = vadd.f32 %v1108_v15, %v1107_v58 }
 0x1b3   : > { %v914_v35 = vadd.f32 %v913_v18, %v912_v62  ;;  %v1110_v44 = vrot.slane %v1109_v10, 4 }
 0x1b5   : > { %v915_v22 = vadd.f32 %v914_v35, %v781_v23  ;;  %v1111_v53 = vadd.f32 %v1110_v44, %v1109_v10 }
 0x1b7   : > { %917 = vst.msk [vmem:[#allocation2] sm:$0x1] %vm916_vm2, %v915_v22  ;;  %v1112_v4 = vrot.slane %v1111_v53, 2 }
 0x1b9   : > { %v1113_v11 = vadd.f32 %v1112_v4, %v1111_v53 }
 0x1bb   : > { %v1114_v5 = vrot.slane %v1113_v11, 1 }
 0x1bd   : > { %v1115_v51 = vadd.f32 %v1114_v5, %v1113_v11 }
 0x1bf   : > { %v1116_v50 = vadd.f32 %v1115_v51, %v918_v49 }
 0x1c1   : > { %1117 = vst.msk [vmem:[#allocation3] sm:$0x1] %vm916_vm2, %v1116_v50 }
 0x1c2 PF: > { %p2328_p10 = scmp.ne.s32.totalorder %s2457_s24, 1 }
 0x1c4   : > { %1121 = sbr.rel (%p2328_p10) target bundleno = 602 (0x25a), region = 64 }
 0x1c9   : > { %v4039_v33 = vld [vmem:[#allocation6_spill] sm:$0xff]  ;;  %v4040_v34 = vld [vmem:[#allocation8_spill] sm:$0xff]  ;;  %v1325_v58 = vsel %vm436_vm0, %v2732_v36, 0.0  ;;  %v1327_v10 = vsel %vm436_vm0, %v2744_v54, 0.0  ;;  %v1329_v11 = vsel %vm436_vm0, %v2756_v6, 0.0  ;;  %v1331_v51 = vsel %vm436_vm0, %v2768_v26, 0.0 }
 0x1ca   : > { %v1316_v25 = vsel %vm436_vm0, %v4039_v33, 0.0  ;;  %v1317_v21 = vsel %vm436_vm0, %v4040_v34, 0.0  ;;  %v4041_v63 = vld [vmem:[#allocation10_spill] sm:$0xff]  ;;  %v4042_v62 = vld [vmem:[#allocation12_spill] sm:$0xff]  ;;  %v1453_v22 = vmul.f32 %v4039_v33, %v4039_v33  ;;  %v1454_v53 = vmul.f32 %v4040_v34, %v4040_v34 }
 0x1cb   : > { %v1319_v31 = vsel %vm436_vm0, %v4041_v63, 0.0  ;;  %v1318_v28 = vadd.f32 %v1317_v21, %v1316_v25  ;;  %v1321_v39 = vsel %vm436_vm0, %v4042_v62, 0.0  ;;  %v4043_v18 = vld [vmem:[#allocation14_spill] sm:$0xff]  ;;  %v1455_v4 = vmul.f32 %v4041_v63, %v4041_v63 }
 0x1cc   : > { %v1323_v15 = vsel %vm436_vm0, %v4043_v18, 0.0  ;;  %v1456_v49 = vmul.f32 %v4042_v62, %v4042_v62  ;;  %v1517_v50 = vsel %vm436_vm0, %v1453_v22, 0.0  ;;  %v1457_v25 = vmul.f32 %v4043_v18, %v4043_v18 }
 0x1cd   : > { %v1320_v9 = vadd.f32 %v1319_v31, %v1318_v28  ;;  %v1518_v34 = vsel %vm436_vm0, %v1454_v53, 0.0  ;;  %v1520_v21 = vsel %vm436_vm0, %v1455_v4, 0.0  ;;  %v1333_v63 = vsel %vm436_vm0, %v2780_v45, 0.0 }
 0x1ce   : > { %v1519_v31 = vadd.f32 %v1518_v34, %v1517_v50  ;;  %v1458_v62 = vmul.f32 %v2732_v36, %v2732_v36  ;;  %v1459_v18 = vmul.f32 %v2744_v54, %v2744_v54  ;;  %v1339_v4 = vsel %vm436_vm0, %v2816_v16, 0.0 }
 0x1cf   : > { %v1322_v23 = vadd.f32 %v1321_v39, %v1320_v9  ;;  %v1522_v39 = vsel %vm436_vm0, %v1456_v49, 0.0  ;;  %v1335_v9 = vsel %vm436_vm0, %v2792_v13, 0.0  ;;  %v1461_v49 = vmul.f32 %v2768_v26, %v2768_v26 }
 0x1d0   : > { %v1526_v53 = vsel %vm436_vm0, %v1458_v62, 0.0  ;;  %v1341_v50 = vsel %vm436_vm0, %v2828_v59, 0.0  ;;  %v1462_v34 = vmul.f32 %v2780_v45, %v2780_v45  ;;  %v1463_v62 = vmul.f32 %v2792_v13, %v2792_v13 }
 0x1d1   : > { %v1324_v35 = vadd.f32 %v1323_v15, %v1322_v23  ;;  %v1521_v15 = vadd.f32 %v1520_v21, %v1519_v31  ;;  %vm1450_vm3 = vcmask 253952  }
 0x1d3   : > { %v1326_v44 = vadd.f32 %v1325_v58, %v1324_v35  ;;  %v1524_v58 = vsel %vm436_vm0, %v1457_v25, 0.0  ;;  %v1337_v35 = vsel %vm436_vm0, %v2804_v38, 0.0 }
 0x1d5   : > { %v1328_v5 = vadd.f32 %v1327_v10, %v1326_v44  ;;  %v1523_v10 = vadd.f32 %v1522_v39, %v1521_v15  ;;  %v1460_v44 = vmul.f32 %v2756_v6, %v2756_v6  ;;  %v1532_v39 = vsel %vm436_vm0, %v1461_v49, 0.0 }
 0x1d6   : > { %v1466_v49 = vmul.f32 %v2828_v59, %v2828_v59 }
 0x1d7   : > { %v1330_v33 = vadd.f32 %v1329_v11, %v1328_v5  ;;  %v1525_v11 = vadd.f32 %v1524_v58, %v1523_v10  ;;  %v1530_v21 = vsel %vm436_vm0, %v1460_v44, 0.0  ;;  %v1534_v58 = vsel %vm436_vm0, %v1462_v34, 0.0 }
 0x1d8   : > { %v1465_v44 = vmul.f32 %v2816_v16, %v2816_v16  ;;  %v1467_v34 = vmul.f32 %v2840_v43, %v2840_v43 }
 0x1d9   : > { %v1332_v28 = vadd.f32 %v1331_v51, %v1330_v33  ;;  %v1528_v51 = vsel %vm436_vm0, %v1459_v18, 0.0  ;;  %v1527_v33 = vadd.f32 %v1526_v53, %v1525_v11  ;;  %v1464_v18 = vmul.f32 %v2804_v38, %v2804_v38 }
 0x1da   : > { %v1536_v53 = vsel %vm436_vm0, %v1463_v62, 0.0  ;;  %v1468_v62 = vmul.f32 %v2852_v29, %v2852_v29 }
 0x1db   : > { %v1334_v23 = vadd.f32 %v1333_v63, %v1332_v28  ;;  %v1343_v63 = vsel %vm436_vm0, %v2840_v43, 0.0  ;;  %v1529_v31 = vadd.f32 %v1528_v51, %v1527_v33  ;;  %v1538_v51 = vsel %vm436_vm0, %v1464_v18, 0.0 }
 0x1dc   : > { %v1469_v18 = vmul.f32 %v2674_v40, %v2674_v40 }
 0x1dd   : > { %v1336_v22 = vadd.f32 %v1335_v9, %v1334_v23  ;;  %v1345_v9 = vsel %vm436_vm0, %v2852_v29, 0.0  ;;  %v1531_v15 = vadd.f32 %v1530_v21, %v1529_v31  ;;  %v1540_v21 = vsel %vm436_vm0, %v1465_v44, 0.0 }
 0x1de   : > { %v1470_v44 = vmul.f32 %v2686_v52, %v2686_v52 }
 0x1df   : > { %v1338_v5 = vadd.f32 %v1337_v35, %v1336_v22  ;;  %v1347_v35 = vsel %vm436_vm0, %v2674_v40, 0.0  ;;  %v1533_v10 = vadd.f32 %v1532_v39, %v1531_v15  ;;  %v1542_v39 = vsel %vm436_vm0, %v1466_v49, 0.0 }
 0x1e0   : > { %v1471_v49 = vmul.f32 %v2698_v0, %v2698_v0 }
 0x1e1   : > { %v1340_v25 = vadd.f32 %v1339_v4, %v1338_v5  ;;  %v1349_v4 = vsel %vm436_vm0, %v2686_v52, 0.0  ;;  %v1535_v11 = vadd.f32 %v1534_v58, %v1533_v10  ;;  %v1544_v58 = vsel %vm436_vm0, %v1467_v34, 0.0 }
 0x1e2   : > { %v1472_v34 = vmul.f32 %v2710_v12, %v2710_v12 }
 0x1e3   : > { %v1342_v28 = vadd.f32 %v1341_v50, %v1340_v25  ;;  %v1351_v50 = vsel %vm436_vm0, %v2698_v0, 0.0  ;;  %v1537_v33 = vadd.f32 %v1536_v53, %v1535_v11  ;;  %v1546_v53 = vsel %vm436_vm0, %v1468_v62, 0.0 }
 0x1e4   : > { %v1473_v62 = vmul.f32 %v2722_v24, %v2722_v24 }
 0x1e5   : > { %v1344_v23 = vadd.f32 %v1343_v63, %v1342_v28  ;;  %v1353_v63 = vsel %vm436_vm0, %v2710_v12, 0.0  ;;  %v1539_v31 = vadd.f32 %v1538_v51, %v1537_v33  ;;  %v1548_v51 = vsel %vm436_vm0, %v1469_v18, 0.0 }
 0x1e6   : > { %v1474_v18 = vmul.f32 %v2734_v37, %v2734_v37 }
 0x1e7   : > { %v1346_v22 = vadd.f32 %v1345_v9, %v1344_v23  ;;  %v1355_v9 = vsel %vm436_vm0, %v2722_v24, 0.0  ;;  %v1541_v15 = vadd.f32 %v1540_v21, %v1539_v31  ;;  %v1550_v21 = vsel %vm436_vm0, %v1470_v44, 0.0 }
 0x1e8   : > { %v1475_v44 = vmul.f32 %v2746_v55, %v2746_v55 }
 0x1e9   : > { %v1348_v5 = vadd.f32 %v1347_v35, %v1346_v22  ;;  %v1357_v35 = vsel %vm436_vm0, %v2734_v37, 0.0  ;;  %v1543_v10 = vadd.f32 %v1542_v39, %v1541_v15  ;;  %v1552_v39 = vsel %vm436_vm0, %v1471_v49, 0.0 }
 0x1ea   : > { %v1476_v49 = vmul.f32 %v2758_v7, %v2758_v7 }
 0x1eb   : > { %v1350_v25 = vadd.f32 %v1349_v4, %v1348_v5  ;;  %v1359_v4 = vsel %vm436_vm0, %v2746_v55, 0.0  ;;  %v1545_v11 = vadd.f32 %v1544_v58, %v1543_v10  ;;  %v1554_v58 = vsel %vm436_vm0, %v1472_v34, 0.0 }
 0x1ec   : > { %v1477_v34 = vmul.f32 %v2770_v27, %v2770_v27 }
 0x1ed   : > { %v1352_v28 = vadd.f32 %v1351_v50, %v1350_v25  ;;  %v1361_v50 = vsel %vm436_vm0, %v2758_v7, 0.0  ;;  %v1547_v33 = vadd.f32 %v1546_v53, %v1545_v11  ;;  %v1556_v53 = vsel %vm436_vm0, %v1473_v62, 0.0 }
 0x1ee   : > { %v1478_v62 = vmul.f32 %v2782_v46, %v2782_v46 }
 0x1ef   : > { %v1354_v23 = vadd.f32 %v1353_v63, %v1352_v28  ;;  %v1363_v63 = vsel %vm436_vm0, %v2770_v27, 0.0  ;;  %v1549_v31 = vadd.f32 %v1548_v51, %v1547_v33  ;;  %v1558_v51 = vsel %vm436_vm0, %v1474_v18, 0.0 }
 0x1f0   : > { %v1479_v18 = vmul.f32 %v2794_v14, %v2794_v14 }
 0x1f1   : > { %v1356_v22 = vadd.f32 %v1355_v9, %v1354_v23  ;;  %v1365_v9 = vsel %vm436_vm0, %v2782_v46, 0.0  ;;  %v1551_v15 = vadd.f32 %v1550_v21, %v1549_v31  ;;  %v1560_v21 = vsel %vm436_vm0, %v1475_v44, 0.0 }
 0x1f2   : > { %v1480_v44 = vmul.f32 %v2806_v41, %v2806_v41 }
 0x1f3   : > { %v1358_v5 = vadd.f32 %v1357_v35, %v1356_v22  ;;  %v1367_v35 = vsel %vm436_vm0, %v2794_v14, 0.0  ;;  %v1553_v10 = vadd.f32 %v1552_v39, %v1551_v15  ;;  %v1562_v39 = vsel %vm436_vm0, %v1476_v49, 0.0 }
 0x1f4   : > { %v1481_v49 = vmul.f32 %v2818_v17, %v2818_v17 }
 0x1f5   : > { %v1360_v25 = vadd.f32 %v1359_v4, %v1358_v5  ;;  %v1369_v4 = vsel %vm436_vm0, %v2806_v41, 0.0  ;;  %v1555_v11 = vadd.f32 %v1554_v58, %v1553_v10  ;;  %v1564_v58 = vsel %vm436_vm0, %v1477_v34, 0.0 }
 0x1f6   : > { %v1482_v34 = vmul.f32 %v2830_v61, %v2830_v61 }
 0x1f7   : > { %v1362_v28 = vadd.f32 %v1361_v50, %v1360_v25  ;;  %v1371_v50 = vsel %vm436_vm0, %v2818_v17, 0.0  ;;  %v1557_v33 = vadd.f32 %v1556_v53, %v1555_v11  ;;  %v1566_v53 = vsel %vm436_vm0, %v1478_v62, 0.0 }
 0x1f8   : > { %v1483_v62 = vmul.f32 %v2842_v57, %v2842_v57 }
 0x1f9   : > { %v1364_v23 = vadd.f32 %v1363_v63, %v1362_v28  ;;  %v1373_v63 = vsel %vm436_vm0, %v2830_v61, 0.0  ;;  %v1559_v31 = vadd.f32 %v1558_v51, %v1557_v33  ;;  %v1568_v51 = vsel %vm436_vm0, %v1479_v18, 0.0 }
 0x1fa   : > { %v1484_v18 = vmul.f32 %v2854_v56, %v2854_v56 }
 0x1fb   : > { %v1366_v22 = vadd.f32 %v1365_v9, %v1364_v23  ;;  %v1375_v9 = vsel %vm436_vm0, %v2842_v57, 0.0  ;;  %v1561_v15 = vadd.f32 %v1560_v21, %v1559_v31  ;;  %v1570_v21 = vsel %vm436_vm0, %v1480_v44, 0.0 }
 0x1fc   : > { %v1485_v44 = vmul.f32 %v2679_v48, %v2679_v48 }
 0x1fd   : > { %v1368_v5 = vadd.f32 %v1367_v35, %v1366_v22  ;;  %v1377_v35 = vsel %vm436_vm0, %v2854_v56, 0.0  ;;  %v1563_v10 = vadd.f32 %v1562_v39, %v1561_v15  ;;  %v1572_v39 = vsel %vm436_vm0, %v1481_v49, 0.0 }
 0x1fe   : > { %v1486_v49 = vmul.f32 %v2691_v60, %v2691_v60 }
 0x1ff   : > { %v1370_v25 = vadd.f32 %v1369_v4, %v1368_v5  ;;  %v1379_v4 = vsel %vm436_vm0, %v2679_v48, 0.0  ;;  %v1565_v11 = vadd.f32 %v1564_v58, %v1563_v10  ;;  %v1574_v58 = vsel %vm436_vm0, %v1482_v34, 0.0 }
 0x200   : > { %v1487_v34 = vmul.f32 %v2703_v8, %v2703_v8 }
 0x201   : > { %v1372_v28 = vadd.f32 %v1371_v50, %v1370_v25  ;;  %v1381_v50 = vsel %vm436_vm0, %v2691_v60, 0.0  ;;  %v1567_v33 = vadd.f32 %v1566_v53, %v1565_v11  ;;  %v1576_v53 = vsel %vm436_vm0, %v1483_v62, 0.0 }
 0x202   : > { %v1488_v62 = vmul.f32 %v2715_v20, %v2715_v20 }
 0x203   : > { %v1374_v23 = vadd.f32 %v1373_v63, %v1372_v28  ;;  %v1383_v63 = vsel %vm436_vm0, %v2703_v8, 0.0  ;;  %v1569_v31 = vadd.f32 %v1568_v51, %v1567_v33  ;;  %v1578_v51 = vsel %vm436_vm0, %v1484_v18, 0.0 }
 0x204   : > { %v1489_v18 = vmul.f32 %v2727_v32, %v2727_v32 }
 0x205   : > { %v1376_v22 = vadd.f32 %v1375_v9, %v1374_v23  ;;  %v1385_v9 = vsel %vm436_vm0, %v2715_v20, 0.0  ;;  %v1571_v15 = vadd.f32 %v1570_v21, %v1569_v31  ;;  %v1580_v21 = vsel %vm436_vm0, %v1485_v44, 0.0 }
 0x206   : > { %v1490_v44 = vmul.f32 %v2739_v47, %v2739_v47 }
 0x207   : > { %v1378_v5 = vadd.f32 %v1377_v35, %v1376_v22  ;;  %v1387_v35 = vsel %vm436_vm0, %v2727_v32, 0.0  ;;  %v1573_v10 = vadd.f32 %v1572_v39, %v1571_v15  ;;  %v1582_v39 = vsel %vm436_vm0, %v1486_v49, 0.0 }
 0x208   : > { %v1491_v49 = vmul.f32 %v2751_v3, %v2751_v3 }
 0x209   : > { %v1380_v25 = vadd.f32 %v1379_v4, %v1378_v5  ;;  %v1389_v4 = vsel %vm436_vm0, %v2739_v47, 0.0  ;;  %v1575_v11 = vadd.f32 %v1574_v58, %v1573_v10  ;;  %v1584_v58 = vsel %vm436_vm0, %v1487_v34, 0.0 }
 0x20a   : > { %v1492_v34 = vmul.f32 %v2763_v19, %v2763_v19 }
 0x20b   : > { %v1382_v28 = vadd.f32 %v1381_v50, %v1380_v25  ;;  %v1391_v50 = vsel %vm436_vm0, %v2751_v3, 0.0  ;;  %v1577_v33 = vadd.f32 %v1576_v53, %v1575_v11  ;;  %v1586_v53 = vsel %vm436_vm0, %v1488_v62, 0.0 }
 0x20d   : > { %v1384_v23 = vadd.f32 %v1383_v63, %v1382_v28  ;;  %v1393_v63 = vsel %vm436_vm0, %v2763_v19, 0.0  ;;  %v1579_v31 = vadd.f32 %v1578_v51, %v1577_v33  ;;  %v1588_v51 = vsel %vm436_vm0, %v1489_v18, 0.0 }
 0x20f   : > { %v1386_v22 = vadd.f32 %v1385_v9, %v1384_v23  ;;  %v1395_v9 = vsel %vm436_vm0, %v2775_v42, 0.0  ;;  %v1581_v15 = vadd.f32 %v1580_v21, %v1579_v31  ;;  %v1590_v21 = vsel %vm436_vm0, %v1490_v44, 0.0 }
 0x211   : > { %v1388_v5 = vadd.f32 %v1387_v35, %v1386_v22  ;;  %v1397_v35 = vsel %vm436_vm0, %v2787_v2, 0.0  ;;  %v1583_v10 = vadd.f32 %v1582_v39, %v1581_v15  ;;  %v1493_v39 = vmul.f32 %v2775_v42, %v2775_v42  ;;  %v4045_v15 = vld [vmem:[#allocation25_spill] sm:$0xff] }
 0x213   : > { %v1390_v25 = vadd.f32 %v1389_v4, %v1388_v5  ;;  %v1399_v4 = vsel %vm436_vm0, %v2799_v30, 0.0  ;;  %v1585_v11 = vadd.f32 %v1584_v58, %v1583_v10  ;;  %v1594_v10 = vsel %vm436_vm0, %v1492_v34, 0.0 }
 0x215   : > { %v1392_v28 = vadd.f32 %v1391_v50, %v1390_v25  ;;  %v1401_v50 = vsel %vm436_vm0, %v2811_v1, 0.0  ;;  %v1587_v33 = vadd.f32 %v1586_v53, %v1585_v11  ;;  %v1495_v11 = vmul.f32 %v2799_v30, %v2799_v30 }
 0x217   : > { %v1394_v23 = vadd.f32 %v1393_v63, %v1392_v28  ;;  %v4044_v63 = vld [vmem:[#allocation23_spill] sm:$0xff]  ;;  %v1589_v28 = vadd.f32 %v1588_v51, %v1587_v33 }
 0x218   : > { %v1403_v31 = vsel %vm436_vm0, %v4044_v63, 0.0 }
 0x219   : > { %v1396_v22 = vadd.f32 %v1395_v9, %v1394_v23  ;;  %v1592_v9 = vsel %vm436_vm0, %v1491_v49, 0.0  ;;  %v1405_v23 = vsel %vm436_vm0, %v4045_v15, 0.0  ;;  %v1591_v18 = vadd.f32 %v1590_v21, %v1589_v28  ;;  %v4047_v49 = vld [vmem:[#allocation29_spill] sm:$0xff]  ;;  %v4048_v21 = vld [vmem:[#allocation7_spill] sm:$0xff] }
 0x21a   : > { %v1409_v51 = vsel %vm436_vm0, %v4047_v49, 0.0 }
 0x21b   : > { %v1398_v5 = vadd.f32 %v1397_v35, %v1396_v22  ;;  %v1494_v35 = vmul.f32 %v2787_v2, %v2787_v2  ;;  %v4046_v22 = vld [vmem:[#allocation27_spill] sm:$0xff]  ;;  %v1593_v53 = vadd.f32 %v1592_v9, %v1591_v18  ;;  %v1497_v9 = vmul.f32 %v4044_v63, %v4044_v63 }
 0x21c   : > { %v1407_v44 = vsel %vm436_vm0, %v4046_v22, 0.0  ;;  %v1499_v63 = vmul.f32 %v4046_v22, %v4046_v22  ;;  %v1501_v22 = vmul.f32 %v4048_v21, %v4048_v21 }
 0x21d   : > { %v1400_v25 = vadd.f32 %v1399_v4, %v1398_v5  ;;  %v1596_v5 = vsel %vm436_vm0, %v1493_v39, 0.0  ;;  %v1598_v34 = vsel %vm436_vm0, %v1494_v35, 0.0  ;;  %v1600_v39 = vsel %vm436_vm0, %v1495_v11, 0.0 }
 0x21e   : > { %v1604_v11 = vsel %vm436_vm0, %v1497_v9, 0.0  ;;  %v1608_v9 = vsel %vm436_vm0, %v1499_v63, 0.0  ;;  %v1612_v63 = vsel %vm436_vm0, %v1501_v22, 0.0 }
 0x21f   : > { %v1402_v62 = vadd.f32 %v1401_v50, %v1400_v25  ;;  %v1595_v50 = vadd.f32 %v1594_v10, %v1593_v53  ;;  %v1496_v25 = vmul.f32 %v2811_v1, %v2811_v1  ;;  %v4050_v53 = vld [vmem:[#allocation11_spill] sm:$0xff] }
 0x221   : > { %v1404_v58 = vadd.f32 %v1403_v31, %v1402_v62  ;;  %v1411_v31 = vsel %vm436_vm0, %v4048_v21, 0.0  ;;  %v1597_v28 = vadd.f32 %v1596_v5, %v1595_v50  ;;  %v1602_v35 = vsel %vm436_vm0, %v1496_v25, 0.0  ;;  %v4051_v50 = vld [vmem:[#allocation13_spill] sm:$0xff] }
 0x222   : > { %v1503_v21 = vmul.f32 %v4050_v53, %v4050_v53 }
 0x223   : > { %v1406_v4 = vadd.f32 %v1405_v23, %v1404_v58  ;;  %v4049_v23 = vld [vmem:[#allocation9_spill] sm:$0xff]  ;;  %v1599_v58 = vadd.f32 %v1598_v34, %v1597_v28  ;;  %v4052_v28 = vld [vmem:[#allocation15_spill] sm:$0xff] }
 0x224   : > { %v1413_v18 = vsel %vm436_vm0, %v4049_v23, 0.0  ;;  %v1616_v22 = vsel %vm436_vm0, %v1503_v21, 0.0 }
 0x225   : > { %v1408_v33 = vadd.f32 %v1407_v44, %v1406_v4  ;;  %v1498_v44 = vmul.f32 %v4045_v15, %v4045_v15  ;;  %v1415_v4 = vsel %vm436_vm0, %v4050_v53, 0.0  ;;  %v1601_v5 = vadd.f32 %v1600_v39, %v1599_v58  ;;  %v4053_v58 = vld [vmem:[#allocation16_spill] sm:$0xff] }
 0x226   : > { %v1500_v15 = vmul.f32 %v4047_v49, %v4047_v49  ;;  %v1502_v49 = vmul.f32 %v4049_v23, %v4049_v23  ;;  %v1504_v23 = vmul.f32 %v4051_v50, %v4051_v50  ;;  %v1505_v53 = vmul.f32 %v4052_v28, %v4052_v28 }
 0x227   : > { %v1410_v62 = vadd.f32 %v1409_v51, %v1408_v33  ;;  %v1417_v33 = vsel %vm436_vm0, %v4051_v50, 0.0  ;;  %v1603_v34 = vadd.f32 %v1602_v35, %v1601_v5  ;;  %v1606_v25 = vsel %vm436_vm0, %v1498_v44, 0.0  ;;  %v4054_v5 = vld [vmem:[#allocation17_spill] sm:$0xff] }
 0x228   : > { %v1610_v44 = vsel %vm436_vm0, %v1500_v15, 0.0  ;;  %v1614_v15 = vsel %vm436_vm0, %v1502_v49, 0.0  ;;  %v1506_v50 = vmul.f32 %v4053_v58, %v4053_v58  ;;  %v1618_v49 = vsel %vm436_vm0, %v1504_v23, 0.0 }
 0x229   : > { %v1412_v10 = vadd.f32 %v1411_v31, %v1410_v62  ;;  %v1419_v62 = vsel %vm436_vm0, %v4052_v28, 0.0  ;;  %v1605_v39 = vadd.f32 %v1604_v11, %v1603_v34  ;;  %v4055_v34 = vld [vmem:[#allocation18_spill] sm:$0xff]  ;;  %v1507_v28 = vmul.f32 %v4054_v5, %v4054_v5 }
 0x22a   : > { %v1620_v21 = vsel %vm436_vm0, %v1505_v53, 0.0  ;;  %v1622_v23 = vsel %vm436_vm0, %v1506_v50, 0.0 }
 0x22b   : > { %v1414_v51 = vadd.f32 %v1413_v18, %v1412_v10  ;;  %v1421_v10 = vsel %vm436_vm0, %v4053_v58, 0.0  ;;  %v1607_v35 = vadd.f32 %v1606_v25, %v1605_v39  ;;  %v4056_v39 = vld [vmem:[#allocation19_spill] sm:$0xff]  ;;  %v1508_v58 = vmul.f32 %v4055_v34, %v4055_v34 }
 0x22c   : > { %v1624_v53 = vsel %vm436_vm0, %v1507_v28, 0.0 }
 0x22d   : > { %v1416_v31 = vadd.f32 %v1415_v4, %v1414_v51  ;;  %v1423_v51 = vsel %vm436_vm0, %v4054_v5, 0.0  ;;  %v1609_v11 = vadd.f32 %v1608_v9, %v1607_v35  ;;  %v4057_v35 = vld [vmem:[#allocation20_spill] sm:$0xff]  ;;  %v1509_v5 = vmul.f32 %v4056_v39, %v4056_v39 }
 0x22f   : > { %v1418_v18 = vadd.f32 %v1417_v33, %v1416_v31  ;;  %v1425_v31 = vsel %vm436_vm0, %v4055_v34, 0.0  ;;  %v1611_v25 = vadd.f32 %v1610_v44, %v1609_v11  ;;  %v4058_v11 = vld [vmem:[#allocation21_spill] sm:$0xff] }
 0x230   : > { %v1511_v50 = vmul.f32 %v4058_v11, %v4058_v11 }
 0x231   : > { %v1420_v4 = vadd.f32 %v1419_v62, %v1418_v18  ;;  %v1427_v18 = vsel %vm436_vm0, %v4056_v39, 0.0  ;;  %v1613_v9 = vadd.f32 %v1612_v63, %v1611_v25  ;;  %v4059_v25 = vld [vmem:[#allocation22_spill] sm:$0xff] }
 0x232   : > { %v1512_v39 = vmul.f32 %v4059_v25, %v4059_v25 }
 0x233   : > { %v1422_v33 = vadd.f32 %v1421_v10, %v1420_v4  ;;  %v1429_v4 = vsel %vm436_vm0, %v4057_v35, 0.0  ;;  %v1615_v44 = vadd.f32 %v1614_v15, %v1613_v9  ;;  %v4060_v9 = vld [vmem:[#allocation24_spill] sm:$0xff] }
 0x235   : > { %v1424_v62 = vadd.f32 %v1423_v51, %v1422_v33  ;;  %v1431_v33 = vsel %vm436_vm0, %v4058_v11, 0.0  ;;  %v1617_v63 = vadd.f32 %v1616_v22, %v1615_v44  ;;  %v1634_v11 = vsel %vm436_vm0, %v1512_v39, 0.0 }
 0x237   : > { %v1426_v10 = vadd.f32 %v1425_v31, %v1424_v62  ;;  %v1433_v62 = vsel %vm436_vm0, %v4059_v25, 0.0  ;;  %v1619_v15 = vadd.f32 %v1618_v49, %v1617_v63  ;;  %v1510_v49 = vmul.f32 %v4057_v35, %v4057_v35 }
 0x238   : > { %v1513_v35 = vmul.f32 %v4060_v9, %v4060_v9 }
 0x239   : > { %v1428_v51 = vadd.f32 %v1427_v18, %v1426_v10  ;;  %v1435_v10 = vsel %vm436_vm0, %v4060_v9, 0.0  ;;  %v1621_v22 = vadd.f32 %v1620_v21, %v1619_v15  ;;  %v1630_v28 = vsel %vm436_vm0, %v1510_v49, 0.0 }
 0x23b   : > { %v1430_v31 = vadd.f32 %v1429_v4, %v1428_v51  ;;  %v1623_v44 = vadd.f32 %v1622_v23, %v1621_v22 }
 0x23d   : > { %v1432_v18 = vadd.f32 %v1431_v33, %v1430_v31  ;;  %v1626_v33 = vsel %vm436_vm0, %v1508_v58, 0.0  ;;  %v1625_v34 = vadd.f32 %v1624_v53, %v1623_v44  ;;  %v1628_v31 = vsel %vm436_vm0, %v1509_v5, 0.0  ;;  %v1315_v53 = vld [vmem:[#allocation2] sm:$0x1] }
 0x23e   : > { %v1632_v58 = vsel %vm436_vm0, %v1511_v50, 0.0  ;;  %v1636_v5 = vsel %vm436_vm0, %v1513_v35, 0.0 }
 0x23f   : > { %v1434_v4 = vadd.f32 %v1433_v62, %v1432_v18  ;;  %v1627_v21 = vadd.f32 %v1626_v33, %v1625_v34 }
 0x241   : > { %v1436_v51 = vadd.f32 %v1435_v10, %v1434_v4  ;;  %v1629_v15 = vadd.f32 %v1628_v31, %v1627_v21  ;;  %v1452_v31 = vld [vmem:[#allocation3] sm:$0x1] }
 0x243   : > { %v1443_v63 = vrot.slane %v1436_v51, 4  ;;  %v1631_v23 = vadd.f32 %v1630_v28, %v1629_v15 }
 0x245   : > { %v1444_v62 = vadd.f32 %v1443_v63, %v1436_v51  ;;  %v1633_v22 = vadd.f32 %v1632_v58, %v1631_v23 }
 0x247   : > { %v1445_v18 = vrot.slane %v1444_v62, 2  ;;  %v1635_v44 = vadd.f32 %v1634_v11, %v1633_v22 }
 0x249   : > { %v1446_v10 = vadd.f32 %v1445_v18, %v1444_v62  ;;  %v1637_v51 = vadd.f32 %v1636_v5, %v1635_v44 }
 0x24b   : > { %v1447_v4 = vrot.slane %v1446_v10, 1  ;;  %v1644_v33 = vrot.slane %v1637_v51, 4 }
 0x24d   : > { %v1448_v25 = vadd.f32 %v1447_v4, %v1446_v10  ;;  %v1645_v34 = vadd.f32 %v1644_v33, %v1637_v51 }
 0x24f   : > { %v1449_v49 = vadd.f32 %v1448_v25, %v1315_v53  ;;  %v1646_v9 = vrot.slane %v1645_v34, 2 }
 0x251   : > { %1451 = vst.msk [vmem:[#allocation2] sm:$0x1] %vm1450_vm3, %v1449_v49  ;;  %v1647_v63 = vadd.f32 %v1646_v9, %v1645_v34 }
 0x253   : > { %v1648_v50 = vrot.slane %v1647_v63, 1 }
 0x255   : > { %v1649_v21 = vadd.f32 %v1648_v50, %v1647_v63 }
 0x257   : > { %v1650_v62 = vadd.f32 %v1649_v21, %v1452_v31 }
 0x259   : > { %1651 = vst.msk [vmem:[#allocation3] sm:$0x1] %vm1450_vm3, %v1650_v62 }
 0x25a PF: > { %p1652_p11 = scmp.eq.s32.totalorder %s2461_s25, 1  ;;  %p1653_p12 = scmp.eq.s32.totalorder %s2457_s24, 0 }
 0x25c   : > { %p1654_p13 = pnand %p1653_p12, %p1652_p11 }
 0x25e   : > { %1657 = sbr.rel (%p1654_p13) target bundleno = 647 (0x287), region = 68 }
 0x263   : > { %v1658_v39 = vld [vmem:[#allocation2] sm:$0x1]  ;;  %v1660_v28 = vld [vmem:[#allocation3] sm:$0x1]  ;;  %vm1678_vm7 = vcmask 253952  }
 0x264   : > { %v1659_v15 = vmul.f32 0.001, %v1658_v39  ;;  %v1661_v18 = vmul.f32 0.001, %v1660_v28  ;;  %v1665_v44 = vld [vmem:[%s3949_s3] sm:$0x1] }
 0x265   : > { %v1680_v33 = vld [vmem:[%s3950_s4] sm:$0x1] }
 0x266   : > { %v1662_v35 = vmul.f32 %v1659_v15, %v1659_v15 }
 0x268   : > { %v1663_v58 = vsub.f32 %v1661_v18, %v1662_v35 }
 0x26a   : > { %v1664_v23 = vmax.f32 %v1663_v58, 0.0 }
 0x26c   : > { %v1666_v10 = vadd.f32 1e-05, %v1664_v23 }
 0x26e   : > { %2430 = vrsqrt.f32 %v1666_v10  ;;  %vm1673_vm4 = vweird.f32 %v1666_v10 }
 0x274   : > { %v2431_v11 = vpop.eup %2430 }
 0x275   : > { %v1668_v22 = vmul.f32 %v2431_v11, %v1666_v10  ;;  %vm1674_vm5 = vweird.f32 %v2431_v11 }
 0x276   : > { %vm1675_vm6 = vmor %vm1673_vm4, %vm1674_vm5 }
 0x277   : > { %v1669_v4 = vmul.f32 %v2431_v11, %v1668_v22 }
 0x279   : > { %v1670_v5 = vmul.f32 0.5, %v1669_v4 }
 0x27b   : > { %v1671_v53 = vsub.f32 1.5, %v1670_v5 }
 0x27d   : > { %v1672_v25 = vmul.f32 %v2431_v11, %v1671_v53 }
 0x27f   : > { %v1676_v51 = vsel %vm1675_vm6, %v2431_v11, %v1672_v25 }
 0x280   : > { %v1677_v49 = vmul.f32 %v1676_v51, %v1665_v44 }
 0x282   : > { %1679 = vst.msk [vmem:[#allocation4] sm:$0x1] %vm1678_vm7, %v1677_v49  ;;  %v1681_v34 = vmul.f32 %v1677_v49, %v1659_v15 }
 0x284   : > { %v1682_v9 = vsub.f32 %v1680_v33, %v1681_v34 }
 0x286   : > { %1683 = vst.msk [vmem:[#allocation5] sm:$0x1] %vm1678_vm7, %v1682_v9 }
 0x287 PF: > { %p2329_p0 = scmp.ne.s32.totalorder %s2461_s25, 1 }
 0x289   : > { %1686 = sbr.rel (%p2329_p0) target bundleno = 919 (0x397), region = 72 }
 0x28e   : > { %v2375_v63 = vld [vmem:[%s3951_s5 + $0x8] sm:$0xff]  ;;  %v3503_v50 = vld [vmem:[#allocation4] ss:$0 sm:$0xff]  ;;  %v3505_v31 = vld [vmem:[#allocation5] ss:$0 sm:$0xff]  ;;  %vm2140_vm8 = vcmask 31744  }
 0x28f   : > { %1977 = vmatpush.bf16.msra.mxu0 %v2375_v63  ;;  %2382 = vmatpush.bf16.msra.mxu1 %v2375_v63  ;;  %v2374_v21 = vld [vmem:[%s3951_s5] sm:$0xff]  ;;  %v4062_v28 = vld [vmem:[#allocation8_spill] sm:$0xff]  ;;  %v1707_v18 = vmul.f32 %v3503_v50, %v2674_v40  ;;  %v1708_v35 = vmul.f32 %v3503_v50, %v2686_v52  ;;  %v1723_v58 = vmul.f32 %v3503_v50, %v2679_v48  ;;  %v4063_v10 = vld [vmem:[#allocation7_spill] sm:$0xff] }
 0x290   : > { %2383 = vmatpush.bf16.msra.mxu2 %v2375_v63  ;;  %2384 = vmatpush.bf16.msra.mxu3 %v2375_v63  ;;  %v4061_v62 = vld [vmem:[#allocation6_spill] sm:$0xff]  ;;  %v1692_v15 = vmul.f32 %v3503_v50, %v4062_v28  ;;  %v1724_v23 = vmul.f32 %v3503_v50, %v2691_v60  ;;  %v1739_v11 = vmul.f32 %v3503_v50, %v4063_v10  ;;  %v4064_v53 = vld [vmem:[#allocation9_spill] sm:$0xff] }
 0x291   : > { %v1691_v39 = vmul.f32 %v3503_v50, %v4061_v62  ;;  %v1775_v5 = vadd.f32 %v3505_v31, %v1707_v18  ;;  %v1740_v40 = vmul.f32 %v3503_v50, %v4064_v53  ;;  %v1776_v52 = vadd.f32 %v3505_v31, %v1708_v35  ;;  %v4065_v9 = vld [vmem:[#allocation10_spill] sm:$0xff]  ;;  %v4067_v35 = vld [vmem:[#allocation11_spill] sm:$0xff] }
 0x292   : > { %v1760_v4 = vadd.f32 %v3505_v31, %v1692_v15  ;;  %v1791_v48 = vadd.f32 %v3505_v31, %v1723_v58  ;;  %v1792_v60 = vadd.f32 %v3505_v31, %v1724_v23  ;;  %v1807_v25 = vadd.f32 %v3505_v31, %v1739_v11  ;;  %v4068_v23 = vld [vmem:[#allocation13_spill] sm:$0xff] }
 0x293   : > { %v1759_v22 = vadd.f32 %v3505_v31, %v1691_v39  ;;  %1978 = vmatpush.bf16.msra.mxu0 %v2374_v21  ;;  %2385 = vmatpush.bf16.msra.mxu1 %v2374_v21  ;;  %v1808_v51 = vadd.f32 %v3505_v31, %v1740_v40  ;;  %v1831_v49 = vpack.c.bf16 %v1776_v52, %v1775_v5 }
 0x294   : > { %2386 = vmatpush.bf16.msra.mxu2 %v2374_v21  ;;  %2387 = vmatpush.bf16.msra.mxu3 %v2374_v21  ;;  %v1839_v33 = vpack.c.bf16 %v1792_v60, %v1791_v48  ;;  %v1693_v63 = vmul.f32 %v3503_v50, %v4065_v9  ;;  %v4066_v21 = vld [vmem:[#allocation12_spill] sm:$0xff]  ;;  %v1709_v39 = vmul.f32 %v3503_v50, %v2698_v0  ;;  %v4069_v60 = vld [vmem:[#allocation14_spill] sm:$0xff]  ;;  %v4070_v9 = vld [vmem:[#allocation15_spill] sm:$0xff] }
 0x295   : > { %v1823_v44 = vpack.c.bf16 %v1760_v4, %v1759_v22  ;;  %v1847_v34 = vpack.c.bf16 %v1808_v51, %v1807_v25  ;;  %v1694_v62 = vmul.f32 %v3503_v50, %v4066_v21  ;;  %v1710_v28 = vmul.f32 %v3503_v50, %v2710_v12  ;;  %v4071_v21 = vld [vmem:[#allocation16_spill] sm:$0xff] }
 0x296   : > { %2346 = vmatmul.msk.bf16.vlgmr.msra.gmra.mxu1 %vm436_vm0, %v1831_v49  ;;  %v1725_v15 = vmul.f32 %v3503_v50, %v2703_v8  ;;  %v1726_v18 = vmul.f32 %v3503_v50, %v2715_v20  ;;  %v1741_v58 = vmul.f32 %v3503_v50, %v4067_v35  ;;  %v1742_v10 = vmul.f32 %v3503_v50, %v4068_v23 }
 0x297   : > { %2338 = vmatmul.msk.bf16.vlgmr.msra.gmra.mxu0 %vm436_vm0, %v1823_v44  ;;  %2354 = vmatmul.msk.bf16.vlgmr.msra.gmra.mxu2 %vm436_vm0, %v1839_v33  ;;  %v1761_v11 = vadd.f32 %v3505_v31, %v1693_v63  ;;  %v1762_v22 = vadd.f32 %v3505_v31, %v1694_v62  ;;  %v1777_v0 = vadd.f32 %v3505_v31, %v1709_v39 }
 0x298   : > { %2362 = vmatmul.msk.bf16.vlgmr.msra.gmra.mxu3 %vm436_vm0, %v1847_v34  ;;  %v1778_v12 = vadd.f32 %v3505_v31, %v1710_v28  ;;  %v1793_v4 = vadd.f32 %v3505_v31, %v1725_v15  ;;  %v1794_v8 = vadd.f32 %v3505_v31, %v1726_v18  ;;  %v1809_v20 = vadd.f32 %v3505_v31, %v1741_v58 }
 0x299   : > { %v1810_v5 = vadd.f32 %v3505_v31, %v1742_v10  ;;  %v1824_v53 = vpack.c.bf16 %v1762_v22, %v1761_v11  ;;  %v1695_v44 = vmul.f32 %v3503_v50, %v4069_v60  ;;  %v1696_v25 = vmul.f32 %v3503_v50, %v2732_v36 }
 0x29a   : > { %v1832_v40 = vpack.c.bf16 %v1778_v12, %v1777_v0  ;;  %v1840_v52 = vpack.c.bf16 %v1794_v8, %v1793_v4  ;;  %v1711_v51 = vmul.f32 %v3503_v50, %v2722_v24  ;;  %v1712_v49 = vmul.f32 %v3503_v50, %v2734_v37  ;;  %v4072_v8 = vld [vmem:[#allocation17_spill] sm:$0xff] }
 0x29b   : > { %v1848_v48 = vpack.c.bf16 %v1810_v5, %v1809_v20  ;;  %v1727_v33 = vmul.f32 %v3503_v50, %v2727_v32  ;;  %v1728_v34 = vmul.f32 %v3503_v50, %v2739_v47  ;;  %v1743_v63 = vmul.f32 %v3503_v50, %v4070_v9  ;;  %v4073_v5 = vld [vmem:[#allocation18_spill] sm:$0xff] }
 0x29c   : > { %v1744_v62 = vmul.f32 %v3503_v50, %v4071_v21  ;;  %v1763_v36 = vadd.f32 %v3505_v31, %v1695_v44  ;;  %v1764_v39 = vadd.f32 %v3505_v31, %v1696_v25  ;;  %v1779_v24 = vadd.f32 %v3505_v31, %v1711_v51  ;;  %v4074_v21 = vld [vmem:[#allocation19_spill] sm:$0xff] }
 0x29d   : > { %v1780_v37 = vadd.f32 %v3505_v31, %v1712_v49  ;;  %v1795_v28 = vadd.f32 %v3505_v31, %v1727_v33  ;;  %v1796_v32 = vadd.f32 %v3505_v31, %v1728_v34  ;;  %v1811_v47 = vadd.f32 %v3505_v31, %v1743_v63 }
 0x29e   : > { %v1812_v15 = vadd.f32 %v3505_v31, %v1744_v62  ;;  %v1825_v18 = vpack.c.bf16 %v1764_v39, %v1763_v36  ;;  %v1697_v10 = vmul.f32 %v3503_v50, %v2744_v54  ;;  %v1698_v11 = vmul.f32 %v3503_v50, %v2756_v6  ;;  %v4075_v36 = vld [vmem:[#allocation20_spill] sm:$0xff] }
 0x29f   : > { %v1833_v35 = vpack.c.bf16 %v1780_v37, %v1779_v24  ;;  %v1841_v58 = vpack.c.bf16 %v1796_v32, %v1795_v28  ;;  %v1713_v22 = vmul.f32 %v3503_v50, %v2746_v55  ;;  %v1714_v0 = vmul.f32 %v3503_v50, %v2758_v7 }
 0x2a0   : > { %v1849_v23 = vpack.c.bf16 %v1812_v15, %v1811_v47  ;;  %v1729_v12 = vmul.f32 %v3503_v50, %v2751_v3  ;;  %v1730_v4 = vmul.f32 %v3503_v50, %v2763_v19  ;;  %v1745_v20 = vmul.f32 %v3503_v50, %v4072_v8 }
 0x2a1   : > { %v1746_v54 = vmul.f32 %v3503_v50, %v4073_v5  ;;  %v1765_v6 = vadd.f32 %v3505_v31, %v1697_v10  ;;  %v1781_v55 = vadd.f32 %v3505_v31, %v1713_v22  ;;  %v1782_v7 = vadd.f32 %v3505_v31, %v1714_v0  ;;  %v4076_v22 = vld [vmem:[#allocation21_spill] sm:$0xff] }
 0x2a2   : > { %v1798_v3 = vadd.f32 %v3505_v31, %v1730_v4  ;;  %v1813_v19 = vadd.f32 %v3505_v31, %v1745_v20  ;;  %v1699_v51 = vmul.f32 %v3503_v50, %v2768_v26  ;;  %v1700_v49 = vmul.f32 %v3503_v50, %v2780_v45 }
 0x2a3   : > { %v1834_v60 = vpack.c.bf16 %v1782_v7, %v1781_v55  ;;  %v1715_v33 = vmul.f32 %v3503_v50, %v2770_v27  ;;  %v1716_v34 = vmul.f32 %v3503_v50, %v2782_v46  ;;  %v1731_v9 = vmul.f32 %v3503_v50, %v2775_v42 }
 0x2a4   : > { %v1732_v63 = vmul.f32 %v3503_v50, %v2787_v2  ;;  %v1747_v62 = vmul.f32 %v3503_v50, %v4074_v21  ;;  %v1748_v26 = vmul.f32 %v3503_v50, %v4075_v36  ;;  %v1767_v45 = vadd.f32 %v3505_v31, %v1699_v51  ;;  %v4081_v51 = vld [vmem:[#allocation26_spill] sm:$0xff] }
 0x2a5   : > { %v1768_v39 = vadd.f32 %v3505_v31, %v1700_v49  ;;  %v1783_v27 = vadd.f32 %v3505_v31, %v1715_v33  ;;  %v1784_v46 = vadd.f32 %v3505_v31, %v1716_v34  ;;  %v1799_v24 = vadd.f32 %v3505_v31, %v1731_v9 }
 0x2a6   : > { %2347 = vmatmul.msk.bf16.gmra.mxu1 %vm436_vm0, %v1832_v40  ;;  %v1797_v40 = vadd.f32 %v3505_v31, %v1729_v12  ;;  %v1800_v42 = vadd.f32 %v3505_v31, %v1732_v63  ;;  %v1815_v2 = vadd.f32 %v3505_v31, %v1747_v62  ;;  %v1816_v37 = vadd.f32 %v3505_v31, %v1748_v26  ;;  %v4077_v12 = vld [vmem:[#allocation22_spill] sm:$0xff] }
 0x2a7   : > { %2339 = vmatmul.msk.bf16.gmra.mxu0 %vm436_vm0, %v1824_v53  ;;  %2355 = vmatmul.msk.bf16.gmra.mxu2 %vm436_vm0, %v1840_v52  ;;  %v1766_v53 = vadd.f32 %v3505_v31, %v1698_v11  ;;  %v1814_v52 = vadd.f32 %v3505_v31, %v1746_v54  ;;  %v1827_v28 = vpack.c.bf16 %v1768_v39, %v1767_v45 }
 0x2a8   : > { %2363 = vmatmul.msk.bf16.gmra.mxu3 %vm436_vm0, %v1848_v48  ;;  %v1842_v44 = vpack.c.bf16 %v1798_v3, %v1797_v40  ;;  %v1835_v32 = vpack.c.bf16 %v1784_v46, %v1783_v27  ;;  %v1843_v47 = vpack.c.bf16 %v1800_v42, %v1799_v24  ;;  %v1851_v15 = vpack.c.bf16 %v1816_v37, %v1815_v2  ;;  %v4082_v24 = vld [vmem:[#allocation27_spill] sm:$0xff]  ;;  %v4083_v2 = vld [vmem:[#allocation29_spill] sm:$0xff] }
 0x2a9   : > { %v1826_v48 = vpack.c.bf16 %v1766_v53, %v1765_v6  ;;  %v1850_v25 = vpack.c.bf16 %v1814_v52, %v1813_v19  ;;  %v1733_v10 = vmul.f32 %v3503_v50, %v2799_v30  ;;  %v1734_v11 = vmul.f32 %v3503_v50, %v2811_v1  ;;  %v4078_v19 = vld [vmem:[#allocation23_spill] sm:$0xff] }
 0x2aa   : > { %v1749_v0 = vmul.f32 %v3503_v50, %v4076_v22  ;;  %v1703_v55 = vmul.f32 %v3503_v50, %v2816_v16  ;;  %v1704_v7 = vmul.f32 %v3503_v50, %v2828_v59  ;;  %v1719_v40 = vmul.f32 %v3503_v50, %v2818_v17 }
 0x2ab   : > { %v1801_v8 = vadd.f32 %v3505_v31, %v1733_v10  ;;  %v1802_v30 = vadd.f32 %v3505_v31, %v1734_v11  ;;  %v1720_v3 = vmul.f32 %v3503_v50, %v2830_v61  ;;  %v1735_v52 = vmul.f32 %v3503_v50, %v4078_v19 }
 0x2ac   : > { %v1817_v1 = vadd.f32 %v3505_v31, %v1749_v0  ;;  %v1752_v16 = vmul.f32 %v3503_v50, %v4081_v51  ;;  %v1771_v59 = vadd.f32 %v3505_v31, %v1703_v55  ;;  %v1772_v49 = vadd.f32 %v3505_v31, %v1704_v7  ;;  %v3737_v0 = vld [vmem:[%s3952_s6] ss:$0 sm:$0xff] }
 0x2ad   : > { %v1844_v6 = vpack.c.bf16 %v1802_v30, %v1801_v8  ;;  %v1787_v17 = vadd.f32 %v3505_v31, %v1719_v40  ;;  %v1788_v61 = vadd.f32 %v3505_v31, %v1720_v3  ;;  %v1803_v33 = vadd.f32 %v3505_v31, %v1735_v52 }
 0x2ae   : > { %v1820_v63 = vadd.f32 %v3505_v31, %v1752_v16  ;;  %v1829_v21 = vpack.c.bf16 %v1772_v49, %v1771_v59  ;;  %v1705_v45 = vmul.f32 %v3503_v50, %v2840_v43  ;;  %v1706_v39 = vmul.f32 %v3503_v50, %v2852_v29 }
 0x2af   : > { %v1837_v62 = vpack.c.bf16 %v1788_v61, %v1787_v17  ;;  %v1721_v27 = vmul.f32 %v3503_v50, %v2842_v57  ;;  %v1722_v46 = vmul.f32 %v3503_v50, %v2854_v56  ;;  %v1737_v42 = vmul.f32 %v3503_v50, %v4082_v24 }
 0x2b0   : > { %v1738_v37 = vmul.f32 %v3503_v50, %v4083_v2  ;;  %v1773_v29 = vadd.f32 %v3505_v31, %v1705_v45 }
 0x2b1   : > { %v1789_v57 = vadd.f32 %v3505_v31, %v1721_v27  ;;  %v1790_v56 = vadd.f32 %v3505_v31, %v1722_v46 }
 0x2b6   : > { %2348 = vmatmul.msk.bf16.gmra.mxu1 %vm436_vm0, %v1833_v35  ;;  %v1702_v35 = vmul.f32 %v3503_v50, %v2804_v38 }
 0x2b7   : > { %2340 = vmatmul.msk.bf16.gmra.mxu0 %vm436_vm0, %v1825_v18  ;;  %2356 = vmatmul.msk.bf16.gmra.mxu2 %vm436_vm0, %v1841_v58  ;;  %v1701_v18 = vmul.f32 %v3503_v50, %v2792_v13  ;;  %v1717_v58 = vmul.f32 %v3503_v50, %v2794_v14  ;;  %v1750_v13 = vmul.f32 %v3503_v50, %v4077_v12 }
 0x2b8   : > { %2364 = vmatmul.msk.bf16.gmra.mxu3 %vm436_vm0, %v1849_v23  ;;  %v1718_v23 = vmul.f32 %v3503_v50, %v2806_v41  ;;  %v1770_v4 = vadd.f32 %v3505_v31, %v1702_v35  ;;  %v1806_v35 = vadd.f32 %v3505_v31, %v1738_v37 }
 0x2b9   : > { %v1769_v38 = vadd.f32 %v3505_v31, %v1701_v18  ;;  %v1785_v14 = vadd.f32 %v3505_v31, %v1717_v58  ;;  %v1818_v20 = vadd.f32 %v3505_v31, %v1750_v13  ;;  %v1805_v18 = vadd.f32 %v3505_v31, %v1737_v42 }
 0x2ba   : > { %v1786_v41 = vadd.f32 %v3505_v31, %v1718_v23 }
 0x2bb   : > { %v1828_v5 = vpack.c.bf16 %v1770_v4, %v1769_v38  ;;  %v1852_v53 = vpack.c.bf16 %v1818_v20, %v1817_v1  ;;  %v1846_v11 = vpack.c.bf16 %v1806_v35, %v1805_v18 }
 0x2bc   : > { %v1836_v54 = vpack.c.bf16 %v1786_v41, %v1785_v14 }
 0x2c6   : > { %2349 = vmatmul.msk.bf16.gmra.mxu1 %vm436_vm0, %v1834_v60 }
 0x2c7   : > { %2341 = vmatmul.msk.bf16.gmra.mxu0 %vm436_vm0, %v1826_v48  ;;  %2357 = vmatmul.msk.bf16.gmra.mxu2 %vm436_vm0, %v1842_v44  ;;  %v4079_v48 = vld [vmem:[#allocation25_spill] sm:$0xff]  ;;  %v4080_v44 = vld [vmem:[#allocation24_spill] sm:$0xff] }
 0x2c8   : > { %2365 = vmatmul.msk.bf16.gmra.mxu3 %vm436_vm0, %v1850_v25  ;;  %v1736_v60 = vmul.f32 %v3503_v50, %v4079_v48  ;;  %v1751_v25 = vmul.f32 %v3503_v50, %v4080_v44 }
 0x2ca   : > { %v1804_v34 = vadd.f32 %v3505_v31, %v1736_v60  ;;  %v1819_v9 = vadd.f32 %v3505_v31, %v1751_v25 }
 0x2cc   : > { %v1845_v36 = vpack.c.bf16 %v1804_v34, %v1803_v33  ;;  %v1853_v26 = vpack.c.bf16 %v1820_v63, %v1819_v9 }
 0x2d6   : > { %2350 = vmatmul.msk.bf16.gmra.mxu1 %vm436_vm0, %v1835_v32 }
 0x2d7   : > { %2342 = vmatmul.msk.bf16.gmra.mxu0 %vm436_vm0, %v1827_v28  ;;  %2358 = vmatmul.msk.bf16.gmra.mxu2 %vm436_vm0, %v1843_v47  ;;  %v4084_v28 = vld [vmem:[#allocation28_spill] sm:$0xff]  ;;  %v4085_v47 = vld [vmem:[#allocation30_spill] sm:$0xff] }
 0x2d8   : > { %2366 = vmatmul.msk.bf16.gmra.mxu3 %vm436_vm0, %v1851_v15  ;;  %v1753_v32 = vmul.f32 %v3503_v50, %v4084_v28  ;;  %v1754_v43 = vmul.f32 %v3503_v50, %v4085_v47  ;;  %v1774_v15 = vadd.f32 %v3505_v31, %v1706_v39  ;;  %v1838_v50 = vpack.c.bf16 %v1790_v56, %v1789_v57 }
 0x2da   : > { %v1821_v58 = vadd.f32 %v3505_v31, %v1753_v32  ;;  %v1822_v23 = vadd.f32 %v3505_v31, %v1754_v43  ;;  %v1830_v10 = vpack.c.bf16 %v1774_v15, %v1773_v29 }
 0x2dc   : > { %v1854_v22 = vpack.c.bf16 %v1822_v23, %v1821_v58 }
 0x2e6   : > { %2351 = vmatmul.msk.bf16.gmra.mxu1 %vm436_vm0, %v1836_v54 }
 0x2e7   : > { %2343 = vmatmul.msk.bf16.gmra.mxu0 %vm436_vm0, %v1828_v5  ;;  %2359 = vmatmul.msk.bf16.gmra.mxu2 %vm436_vm0, %v1844_v6 }
 0x2e8   : > { %2367 = vmatmul.msk.bf16.gmra.mxu3 %vm436_vm0, %v1852_v53 }
 0x2f6   : > { %2352 = vmatmul.msk.bf16.gmra.mxu1 %vm436_vm0, %v1837_v62 }
 0x2f7   : > { %2344 = vmatmul.msk.bf16.gmra.mxu0 %vm436_vm0, %v1829_v21  ;;  %2360 = vmatmul.msk.bf16.gmra.mxu2 %vm436_vm0, %v1845_v36 }
 0x2f8   : > { %2368 = vmatmul.msk.bf16.gmra.mxu3 %vm436_vm0, %v1853_v26 }
 0x306   : > { %2353 = vmatmul.msk.bf16.gmra.mxu1 %vm436_vm0, %v1838_v50 }
 0x307   : > { %2345 = vmatmul.msk.bf16.gmra.mxu0 %vm436_vm0, %v1830_v10  ;;  %2361 = vmatmul.msk.bf16.gmra.mxu2 %vm436_vm0, %v1846_v11 }
 0x308   : > { %2369 = vmatmul.msk.bf16.gmra.mxu3 %vm436_vm0, %v1854_v22 }
 0x313   : > { %v2020_v13 = vpop.f32.mrf.mxu1 }
 0x314   : > { %v1980_v31 = vpop.f32.mrf.mxu0  ;;  %v2021_v38 = vadd.f32 %v3737_v0, %v2020_v13 }
 0x315   : > { %v1981_v12 = vadd.f32 %v3737_v0, %v1980_v31 }
 0x316   : > { %2157 = vst.msk [vmem:[%s2567_s22 + $0x80] sm:$0xff] %vm2140_vm8, %v2021_v38 }
 0x317   : > { %2141 = vst.msk [vmem:[%s2567_s22] sm:$0xff] %vm2140_vm8, %v1981_v12 }
 0x31a   : > { %v2060_v4 = vpop.f32.mrf.mxu2 }
 0x31b   : > { %v2061_v14 = vadd.f32 %v3737_v0, %v2060_v4  ;;  %v2100_v41 = vpop.f32.mrf.mxu3  ;;  %v2022_v20 = vpop.f32.mrf.mxu1 }
 0x31c   : > { %v1982_v8 = vpop.f32.mrf.mxu0  ;;  %v2101_v30 = vadd.f32 %v3737_v0, %v2100_v41  ;;  %v2023_v5 = vadd.f32 %v3737_v0, %v2022_v20 }
 0x31d   : > { %v1983_v1 = vadd.f32 %v3737_v0, %v1982_v8  ;;  %2173 = vst.msk [vmem:[%s2567_s22 + $0x100] sm:$0xff] %vm2140_vm8, %v2061_v14 }
 0x31e   : > { %2189 = vst.msk [vmem:[%s2567_s22 + $0x180] sm:$0xff] %vm2140_vm8, %v2101_v30 }
 0x31f   : > { %2142 = vst.msk [vmem:[%s2567_s22 + $0x8] sm:$0xff] %vm2140_vm8, %v1983_v1 }
 0x320   : > { %2158 = vst.msk [vmem:[%s2567_s22 + $0x88] sm:$0xff] %vm2140_vm8, %v2023_v5 }
 0x322   : > { %v2062_v54 = vpop.f32.mrf.mxu2 }
 0x323   : > { %v2063_v6 = vadd.f32 %v3737_v0, %v2062_v54  ;;  %v2102_v53 = vpop.f32.mrf.mxu3  ;;  %v2025_v3 = vpop.f32.mrf.mxu1 }
 0x324   : > { %v1985_v55 = vpop.f32.mrf.mxu0  ;;  %v2103_v7 = vadd.f32 %v3737_v0, %v2102_v53  ;;  %v2026_v19 = vadd.f32 %v3737_v0, %v2025_v3 }
 0x325   : > { %v1986_v40 = vadd.f32 %v3737_v0, %v1985_v55  ;;  %2174 = vst.msk [vmem:[%s2567_s22 + $0x108] sm:$0xff] %vm2140_vm8, %v2063_v6 }
 0x326   : > { %2190 = vst.msk [vmem:[%s2567_s22 + $0x188] sm:$0xff] %vm2140_vm8, %v2103_v7 }
 0x327   : > { %2143 = vst.msk [vmem:[%s2567_s22 + $0x10] sm:$0xff] %vm2140_vm8, %v1986_v40 }
 0x328   : > { %2159 = vst.msk [vmem:[%s2567_s22 + $0x90] sm:$0xff] %vm2140_vm8, %v2026_v19 }
 0x32a   : > { %v2065_v52 = vpop.f32.mrf.mxu2 }
 0x32b   : > { %v2066_v48 = vadd.f32 %v3737_v0, %v2065_v52  ;;  %v2105_v60 = vpop.f32.mrf.mxu3  ;;  %v2027_v16 = vpop.f32.mrf.mxu1 }
 0x32c   : > { %v1987_v44 = vpop.f32.mrf.mxu0  ;;  %v2106_v25 = vadd.f32 %v3737_v0, %v2105_v60  ;;  %v2028_v59 = vadd.f32 %v3737_v0, %v2027_v16 }
 0x32d   : > { %v1988_v51 = vadd.f32 %v3737_v0, %v1987_v44  ;;  %2175 = vst.msk [vmem:[%s2567_s22 + $0x110] sm:$0xff] %vm2140_vm8, %v2066_v48 }
 0x32e   : > { %2191 = vst.msk [vmem:[%s2567_s22 + $0x190] sm:$0xff] %vm2140_vm8, %v2106_v25 }
 0x32f   : > { %2144 = vst.msk [vmem:[%s2567_s22 + $0x18] sm:$0xff] %vm2140_vm8, %v1988_v51 }
 0x330   : > { %2160 = vst.msk [vmem:[%s2567_s22 + $0x98] sm:$0xff] %vm2140_vm8, %v2028_v59 }
 0x332   : > { %v2067_v49 = vpop.f32.mrf.mxu2 }
 0x333   : > { %v2068_v17 = vadd.f32 %v3737_v0, %v2067_v49  ;;  %v2107_v61 = vpop.f32.mrf.mxu3  ;;  %v2030_v63 = vpop.f32.mrf.mxu1 }
 0x334   : > { %v1990_v33 = vpop.f32.mrf.mxu0  ;;  %v2108_v34 = vadd.f32 %v3737_v0, %v2107_v61  ;;  %v2031_v21 = vadd.f32 %v3737_v0, %v2030_v63 }
 0x335   : > { %v1991_v9 = vadd.f32 %v3737_v0, %v1990_v33  ;;  %2176 = vst.msk [vmem:[%s2567_s22 + $0x118] sm:$0xff] %vm2140_vm8, %v2068_v17 }
 0x336   : > { %2192 = vst.msk [vmem:[%s2567_s22 + $0x198] sm:$0xff] %vm2140_vm8, %v2108_v34 }
 0x337   : > { %2145 = vst.msk [vmem:[%s2567_s22 + $0x20] sm:$0xff] %vm2140_vm8, %v1991_v9 }
 0x338   : > { %2161 = vst.msk [vmem:[%s2567_s22 + $0xa0] sm:$0xff] %vm2140_vm8, %v2031_v21 }
 0x33a   : > { %v2070_v62 = vpop.f32.mrf.mxu2 }
 0x33b   : > { %v2071_v36 = vadd.f32 %v3737_v0, %v2070_v62  ;;  %v2110_v26 = vpop.f32.mrf.mxu3  ;;  %v2032_v46 = vpop.f32.mrf.mxu1 }
 0x33c   : > { %v1992_v45 = vpop.f32.mrf.mxu0  ;;  %v2111_v39 = vadd.f32 %v3737_v0, %v2110_v26  ;;  %v2033_v24 = vadd.f32 %v3737_v0, %v2032_v46 }
 0x33d   : > { %v1993_v27 = vadd.f32 %v3737_v0, %v1992_v45  ;;  %2177 = vst.msk [vmem:[%s2567_s22 + $0x120] sm:$0xff] %vm2140_vm8, %v2071_v36 }
 0x33e   : > { %2193 = vst.msk [vmem:[%s2567_s22 + $0x1a0] sm:$0xff] %vm2140_vm8, %v2111_v39 }
 0x33f   : > { %2146 = vst.msk [vmem:[%s2567_s22 + $0x28] sm:$0xff] %vm2140_vm8, %v1993_v27 }
 0x340   : > { %2162 = vst.msk [vmem:[%s2567_s22 + $0xa8] sm:$0xff] %vm2140_vm8, %v2033_v24 }
 0x342   : > { %v2072_v42 = vpop.f32.mrf.mxu2 }
 0x343   : > { %v2073_v2 = vadd.f32 %v3737_v0, %v2072_v42  ;;  %v2112_v37 = vpop.f32.mrf.mxu3  ;;  %v2035_v43 = vpop.f32.mrf.mxu1 }
 0x344   : > { %v1995_v28 = vpop.f32.mrf.mxu0  ;;  %v2113_v32 = vadd.f32 %v3737_v0, %v2112_v37  ;;  %v2036_v29 = vadd.f32 %v3737_v0, %v2035_v43 }
 0x345   : > { %v1996_v47 = vadd.f32 %v3737_v0, %v1995_v28  ;;  %2178 = vst.msk [vmem:[%s2567_s22 + $0x128] sm:$0xff] %vm2140_vm8, %v2073_v2 }
 0x346   : > { %2194 = vst.msk [vmem:[%s2567_s22 + $0x1a8] sm:$0xff] %vm2140_vm8, %v2113_v32 }
 0x347   : > { %2147 = vst.msk [vmem:[%s2567_s22 + $0x30] sm:$0xff] %vm2140_vm8, %v1996_v47 }
 0x348   : > { %2163 = vst.msk [vmem:[%s2567_s22 + $0xb0] sm:$0xff] %vm2140_vm8, %v2036_v29 }
 0x34a   : > { %v2075_v15 = vpop.f32.mrf.mxu2 }
 0x34b   : > { %v2076_v57 = vadd.f32 %v3737_v0, %v2075_v15  ;;  %v2115_v56 = vpop.f32.mrf.mxu3  ;;  %v2037_v23 = vpop.f32.mrf.mxu1 }
 0x34c   : > { %v1997_v18 = vpop.f32.mrf.mxu0  ;;  %v2116_v35 = vadd.f32 %v3737_v0, %v2115_v56  ;;  %v2038_v10 = vadd.f32 %v3737_v0, %v2037_v23 }
 0x34d   : > { %v1998_v58 = vadd.f32 %v3737_v0, %v1997_v18  ;;  %2179 = vst.msk [vmem:[%s2567_s22 + $0x130] sm:$0xff] %vm2140_vm8, %v2076_v57 }
 0x34e   : > { %2195 = vst.msk [vmem:[%s2567_s22 + $0x1b0] sm:$0xff] %vm2140_vm8, %v2116_v35 }
 0x34f   : > { %2148 = vst.msk [vmem:[%s2567_s22 + $0x38] sm:$0xff] %vm2140_vm8, %v1998_v58 }
 0x350   : > { %2164 = vst.msk [vmem:[%s2567_s22 + $0xb8] sm:$0xff] %vm2140_vm8, %v2038_v10 }
 0x352   : > { %v2077_v50 = vpop.f32.mrf.mxu2 }
 0x353   : > { %v2078_v11 = vadd.f32 %v3737_v0, %v2077_v50  ;;  %v2117_v22 = vpop.f32.mrf.mxu3  ;;  %v2040_v38 = vpop.f32.mrf.mxu1 }
 0x354   : > { %v2000_v31 = vpop.f32.mrf.mxu0  ;;  %v2118_v12 = vadd.f32 %v3737_v0, %v2117_v22  ;;  %v2041_v4 = vadd.f32 %v3737_v0, %v2040_v38 }
 0x355   : > { %v2001_v13 = vadd.f32 %v3737_v0, %v2000_v31  ;;  %2180 = vst.msk [vmem:[%s2567_s22 + $0x138] sm:$0xff] %vm2140_vm8, %v2078_v11 }
 0x356   : > { %2196 = vst.msk [vmem:[%s2567_s22 + $0x1b8] sm:$0xff] %vm2140_vm8, %v2118_v12 }
 0x357   : > { %2149 = vst.msk [vmem:[%s2567_s22 + $0x40] sm:$0xff] %vm2140_vm8, %v2001_v13 }
 0x358   : > { %2165 = vst.msk [vmem:[%s2567_s22 + $0xc0] sm:$0xff] %vm2140_vm8, %v2041_v4 }
 0x35a   : > { %v2080_v14 = vpop.f32.mrf.mxu2 }
 0x35b   : > { %v2081_v41 = vadd.f32 %v3737_v0, %v2080_v14  ;;  %v2120_v8 = vpop.f32.mrf.mxu3  ;;  %v2042_v5 = vpop.f32.mrf.mxu1 }
 0x35c   : > { %v2002_v30 = vpop.f32.mrf.mxu0  ;;  %v2121_v1 = vadd.f32 %v3737_v0, %v2120_v8  ;;  %v2043_v54 = vadd.f32 %v3737_v0, %v2042_v5 }
 0x35d   : > { %v2003_v20 = vadd.f32 %v3737_v0, %v2002_v30  ;;  %2181 = vst.msk [vmem:[%s2567_s22 + $0x140] sm:$0xff] %vm2140_vm8, %v2081_v41 }
 0x35e   : > { %2197 = vst.msk [vmem:[%s2567_s22 + $0x1c0] sm:$0xff] %vm2140_vm8, %v2121_v1 }
 0x35f   : > { %2150 = vst.msk [vmem:[%s2567_s22 + $0x48] sm:$0xff] %vm2140_vm8, %v2003_v20 }
 0x360   : > { %2166 = vst.msk [vmem:[%s2567_s22 + $0xc8] sm:$0xff] %vm2140_vm8, %v2043_v54 }
 0x362   : > { %v2082_v6 = vpop.f32.mrf.mxu2 }
 0x363   : > { %v2083_v53 = vadd.f32 %v3737_v0, %v2082_v6  ;;  %v2122_v55 = vpop.f32.mrf.mxu3  ;;  %v2045_v19 = vpop.f32.mrf.mxu1 }
 0x364   : > { %v2005_v7 = vpop.f32.mrf.mxu0  ;;  %v2123_v40 = vadd.f32 %v3737_v0, %v2122_v55  ;;  %v2046_v52 = vadd.f32 %v3737_v0, %v2045_v19 }
 0x365   : > { %v2006_v3 = vadd.f32 %v3737_v0, %v2005_v7  ;;  %2182 = vst.msk [vmem:[%s2567_s22 + $0x148] sm:$0xff] %vm2140_vm8, %v2083_v53 }
 0x366   : > { %2198 = vst.msk [vmem:[%s2567_s22 + $0x1c8] sm:$0xff] %vm2140_vm8, %v2123_v40 }
 0x367   : > { %2151 = vst.msk [vmem:[%s2567_s22 + $0x50] sm:$0xff] %vm2140_vm8, %v2006_v3 }
 0x368   : > { %2167 = vst.msk [vmem:[%s2567_s22 + $0xd0] sm:$0xff] %vm2140_vm8, %v2046_v52 }
 0x36a   : > { %v2085_v48 = vpop.f32.mrf.mxu2 }
 0x36b   : > { %v2086_v60 = vadd.f32 %v3737_v0, %v2085_v48  ;;  %v2125_v44 = vpop.f32.mrf.mxu3  ;;  %v2047_v59 = vpop.f32.mrf.mxu1 }
 0x36c   : > { %v2007_v25 = vpop.f32.mrf.mxu0  ;;  %v2126_v51 = vadd.f32 %v3737_v0, %v2125_v44  ;;  %v2048_v49 = vadd.f32 %v3737_v0, %v2047_v59 }
 0x36d   : > { %v2008_v16 = vadd.f32 %v3737_v0, %v2007_v25  ;;  %2183 = vst.msk [vmem:[%s2567_s22 + $0x150] sm:$0xff] %vm2140_vm8, %v2086_v60 }
 0x36e   : > { %2199 = vst.msk [vmem:[%s2567_s22 + $0x1d0] sm:$0xff] %vm2140_vm8, %v2126_v51 }
 0x36f   : > { %2152 = vst.msk [vmem:[%s2567_s22 + $0x58] sm:$0xff] %vm2140_vm8, %v2008_v16 }
 0x370   : > { %2168 = vst.msk [vmem:[%s2567_s22 + $0xd8] sm:$0xff] %vm2140_vm8, %v2048_v49 }
 0x372   : > { %v2087_v17 = vpop.f32.mrf.mxu2 }
 0x373   : > { %v2088_v61 = vadd.f32 %v3737_v0, %v2087_v17  ;;  %v2127_v33 = vpop.f32.mrf.mxu3  ;;  %v2050_v21 = vpop.f32.mrf.mxu1 }
 0x374   : > { %v2010_v34 = vpop.f32.mrf.mxu0  ;;  %v2128_v9 = vadd.f32 %v3737_v0, %v2127_v33  ;;  %v2051_v62 = vadd.f32 %v3737_v0, %v2050_v21 }
 0x375   : > { %v2011_v63 = vadd.f32 %v3737_v0, %v2010_v34  ;;  %2184 = vst.msk [vmem:[%s2567_s22 + $0x158] sm:$0xff] %vm2140_vm8, %v2088_v61 }
 0x376   : > { %2200 = vst.msk [vmem:[%s2567_s22 + $0x1d8] sm:$0xff] %vm2140_vm8, %v2128_v9 }
 0x377   : > { %2153 = vst.msk [vmem:[%s2567_s22 + $0x60] sm:$0xff] %vm2140_vm8, %v2011_v63 }
 0x378   : > { %2169 = vst.msk [vmem:[%s2567_s22 + $0xe0] sm:$0xff] %vm2140_vm8, %v2051_v62 }
 0x37a   : > { %v2090_v36 = vpop.f32.mrf.mxu2 }
 0x37b   : > { %v2091_v26 = vadd.f32 %v3737_v0, %v2090_v36  ;;  %v2130_v45 = vpop.f32.mrf.mxu3  ;;  %v2052_v24 = vpop.f32.mrf.mxu1 }
 0x37c   : > { %v2012_v39 = vpop.f32.mrf.mxu0  ;;  %v2131_v27 = vadd.f32 %v3737_v0, %v2130_v45  ;;  %v2053_v42 = vadd.f32 %v3737_v0, %v2052_v24 }
 0x37d   : > { %v2013_v46 = vadd.f32 %v3737_v0, %v2012_v39  ;;  %2185 = vst.msk [vmem:[%s2567_s22 + $0x160] sm:$0xff] %vm2140_vm8, %v2091_v26 }
 0x37e   : > { %2201 = vst.msk [vmem:[%s2567_s22 + $0x1e0] sm:$0xff] %vm2140_vm8, %v2131_v27 }
 0x37f   : > { %2154 = vst.msk [vmem:[%s2567_s22 + $0x68] sm:$0xff] %vm2140_vm8, %v2013_v46 }
 0x380   : > { %2170 = vst.msk [vmem:[%s2567_s22 + $0xe8] sm:$0xff] %vm2140_vm8, %v2053_v42 }
 0x382   : > { %v2092_v2 = vpop.f32.mrf.mxu2 }
 0x383   : > { %v2093_v37 = vadd.f32 %v3737_v0, %v2092_v2  ;;  %v2132_v28 = vpop.f32.mrf.mxu3  ;;  %v2055_v29 = vpop.f32.mrf.mxu1 }
 0x384   : > { %v2015_v32 = vpop.f32.mrf.mxu0  ;;  %v2133_v47 = vadd.f32 %v3737_v0, %v2132_v28  ;;  %v2056_v15 = vadd.f32 %v3737_v0, %v2055_v29 }
 0x385   : > { %v2016_v43 = vadd.f32 %v3737_v0, %v2015_v32  ;;  %2186 = vst.msk [vmem:[%s2567_s22 + $0x168] sm:$0xff] %vm2140_vm8, %v2093_v37 }
 0x386   : > { %2202 = vst.msk [vmem:[%s2567_s22 + $0x1e8] sm:$0xff] %vm2140_vm8, %v2133_v47 }
 0x387   : > { %2155 = vst.msk [vmem:[%s2567_s22 + $0x70] sm:$0xff] %vm2140_vm8, %v2016_v43 }
 0x388   : > { %2171 = vst.msk [vmem:[%s2567_s22 + $0xf0] sm:$0xff] %vm2140_vm8, %v2056_v15 }
 0x38a   : > { %v2095_v57 = vpop.f32.mrf.mxu2 }
 0x38b   : > { %v2096_v56 = vadd.f32 %v3737_v0, %v2095_v57  ;;  %v2135_v18 = vpop.f32.mrf.mxu3  ;;  %v2057_v10 = vpop.f32.mrf.mxu1 }
 0x38c   : > { %v2017_v35 = vpop.f32.mrf.mxu0  ;;  %v2136_v58 = vadd.f32 %v3737_v0, %v2135_v18  ;;  %v2058_v50 = vadd.f32 %v3737_v0, %v2057_v10 }
 0x38d   : > { %v2018_v23 = vadd.f32 %v3737_v0, %v2017_v35  ;;  %2187 = vst.msk [vmem:[%s2567_s22 + $0x170] sm:$0xff] %vm2140_vm8, %v2096_v56 }
 0x38e   : > { %2203 = vst.msk [vmem:[%s2567_s22 + $0x1f0] sm:$0xff] %vm2140_vm8, %v2136_v58 }
 0x38f   : > { %2156 = vst.msk [vmem:[%s2567_s22 + $0x78] sm:$0xff] %vm2140_vm8, %v2018_v23 }
 0x390   : > { %2172 = vst.msk [vmem:[%s2567_s22 + $0xf8] sm:$0xff] %vm2140_vm8, %v2058_v50 }
 0x392   : > { %v2097_v11 = vpop.f32.mrf.mxu2 }
 0x393   : > { %v2098_v22 = vadd.f32 %v3737_v0, %v2097_v11  ;;  %v2137_v31 = vpop.f32.mrf.mxu3 }
 0x394   : > { %v2138_v12 = vadd.f32 %v3737_v0, %v2137_v31 }
 0x395   : > { %2188 = vst.msk [vmem:[%s2567_s22 + $0x178] sm:$0xff] %vm2140_vm8, %v2098_v22 }
 0x396   : > { %2204 = vst.msk [vmem:[%s2567_s22 + $0x1f8] sm:$0xff] %vm2140_vm8, %v2138_v12 }
 0x397 PF: > { %s17_s28 = sadd.s32 1, %s2473_s28   ;;  %s4086_s24 = smov %s2465_s26 }
 0x398   : > { %p14_p1 = scmp.ge.s32.totalorder %s17_s28, 6   ;;  %s4087_s25 = smov %s2469_s27 }
 0x399   : > { %s4088_s26 = smov %s4091_s29  ;;  %s4089_s27 = smov %s4095_s30 }
 0x39a   :  { %16 = sbr.rel (!%p14_p1) target bundleno = 3 (0x3), region = 102 }

</bundles_post_ra>
